<compile_context>
chip_gen: v5e
topology: v5e:2x2
jax: 0.10.0
libtpu: 0.0.40
codegen_flags: <defaults>
</compile_context>

<pallas_src>
import math
from functools import partial

import jax
import jax.numpy as jnp
from jax import lax
from jax.experimental import pallas as pl
from jax.experimental.pallas import tpu as pltpu

NEG_BIG = -1e30   # finite stand-in for -inf (avoids inf-inf NaNs in the online softmax)
LANE = 128        # TPU lane width


def _round_up(x, m):
    return (x + m - 1) // m * m


def node_block_kernel(idx_ref, node_ref, edge_ref,
                      w1a_ref, w1b_ref, b1_ref, w2_ref, b2_ref,
                      out_ref,
                      m_ref, l_ref, acc_ref,
                      *, inv_scale):
    """One grid step: (node tile `nt`) x (edge tile `et`); `et` is the reduction axis."""
    nt = pl.program_id(0)
    et = pl.program_id(1)

    @pl.when(et == 0)
    def _init():
        m_ref[...] = jnp.full_like(m_ref, NEG_BIG)
        l_ref[...] = jnp.zeros_like(l_ref)
        acc_ref[...] = jnp.zeros_like(acc_ref)

    node = node_ref[...]            # (TN, Fp)  bf16
    edge = edge_ref[...]            # (TE, Fp)  bf16 (two-way edge features)
    idx = idx_ref[...]              # (1,  TE)  int32: node each two-way edge points to
    tn, te = node.shape[0], edge.shape[0]

    # membership mask: match[n, e] <=> edge e is aggregated into node (nt*TN + n)
    node_ids = lax.broadcasted_iota(jnp.int32, (tn, te), 0) + nt * tn
    match = node_ids == idx                                              # (TN, TE) bool

    # attention logits for every (node-in-tile, edge-in-tile) pair: one bf16 MXU matmul
    s = lax.dot_general(node, edge, (((1,), (1,)), ((), ())),
                        preferred_element_type=jnp.float32) * inv_scale  # (TN, TE) f32
    s = jnp.where(match, s, NEG_BIG)

    # online scatter-softmax update (all element-wise math in f32)
    m_prev = m_ref[...]                                                  # (TN, 1)
    m_new = jnp.maximum(m_prev, jnp.max(s, axis=1, keepdims=True))
    alpha = jnp.exp(m_prev - m_new)                                      # (TN, 1)
    p = jnp.where(match, jnp.exp(s - m_new), 0.0)                        # (TN, TE) f32

    l_ref[...] = alpha * l_ref[...] + jnp.sum(p, axis=1, keepdims=True)
    acc_ref[...] = alpha * acc_ref[...] + lax.dot_general(
        p.astype(jnp.bfloat16), edge, (((1,), (0,)), ((), ())),
        preferred_element_type=jnp.float32)                              # (TN, Fp)
    m_ref[...] = m_new

    # epilogue on the finished node tile: normalize + fused Linear-ReLU-Linear MLP
    @pl.when(et == pl.num_programs(1) - 1)
    def _finalize():
        l = l_ref[...]
        inv_l = jnp.where(l > 0.0, pl.reciprocal(l, approx=True), 0.0)   # isolated nodes -> 0
        agg = (acc_ref[...] * inv_l).astype(jnp.bfloat16)                # (TN, Fp)

        # cat([node_agg, node_attr], dim=1) @ W1  ==  agg @ W1_top + node_attr @ W1_bot
        h = lax.dot_general(agg, w1a_ref[...], (((1,), (0,)), ((), ())),
                            preferred_element_type=jnp.float32)
        h = h + lax.dot_general(node, w1b_ref[...], (((1,), (0,)), ((), ())),
                                preferred_element_type=jnp.float32)
        h = jnp.maximum(h + b1_ref[...], 0.0).astype(jnp.bfloat16)       # (TN, Hp)
        out = lax.dot_general(h, w2_ref[...], (((1,), (0,)), ((), ())),
                              preferred_element_type=jnp.float32)
        out_ref[...] = out + b2_ref[...]                                 # (TN, Fout_p)


def node_block_forward(node_attr, edge_index, edge_attr, params, *,
                       node_tile=128, edge_tile=128):
    """Attention branch of NodeBlock.forward. Returns dict mimicking Data(...)."""
    N, F = node_attr.shape
    E = edge_attr.shape[0]
    assert edge_attr.shape[1] == 2 * F

    # PyTorch glue: torch.cat(torch.chunk(edge_attr, 2, dim=-1), dim=0) and the
    # two-way out-degree node index torch.cat([receivers, senders], dim=0).
    twoway_edge = jnp.concatenate([edge_attr[:, :F], edge_attr[:, F:]], axis=0)  # (2E, F)
    senders, receivers = edge_index
    idx = jnp.concatenate([receivers, senders], axis=0).astype(jnp.int32)        # (2E,)

    w1, b1, w2, b2 = params
    H = w1.shape[1]
    Fout = w2.shape[1]

    # lane-dense (multiple-of-128) feature padding + tile padding of node / edge counts
    Fp = _round_up(F, LANE)
    Hp = _round_up(H, LANE)
    Fop = _round_up(Fout, LANE)
    Np = _round_up(N, node_tile)
    E2 = 2 * E
    E2p = _round_up(E2, edge_tile)

    bf16 = jnp.bfloat16
    node_p = jnp.zeros((Np, Fp), bf16).at[:N, :F].set(node_attr.astype(bf16))
    edge_p = jnp.zeros((E2p, Fp), bf16).at[:E2, :F].set(twoway_edge.astype(bf16))
    idx_p = jnp.full((1, E2p), -1, jnp.int32).at[0, :E2].set(idx)   # -1 never matches a node

    # MLP params: split/pad, bf16 for the MXU (zero pads are exact and inert)
    w1a = jnp.zeros((Fp, Hp), bf16).at[:F, :H].set(w1[:F].astype(bf16))   # multiplies node_agg
    w1b = jnp.zeros((Fp, Hp), bf16).at[:F, :H].set(w1[F:].astype(bf16))   # multiplies node_attr
    b1p = jnp.zeros((1, Hp), jnp.float32).at[0, :H].set(b1.reshape(-1).astype(jnp.float32))
    w2p = jnp.zeros((Hp, Fop), bf16).at[:H, :Fout].set(w2.astype(bf16))
    b2p = jnp.zeros((1, Fop), jnp.float32).at[0, :Fout].set(b2.reshape(-1).astype(jnp.float32))

    inv_scale = 1.0 / math.sqrt(float(F))   # scale = sqrt(input_size), folded to a multiply

    grid = (Np // node_tile, E2p // edge_tile)
    out_p = pl.pallas_call(
        partial(node_block_kernel, inv_scale=inv_scale),
        out_shape=jax.ShapeDtypeStruct((Np, Fop), jnp.float32),
        grid=grid,
        in_specs=[
            pl.BlockSpec((1, edge_tile), lambda nt, et: (0, et)),    # edge -> node index
            pl.BlockSpec((node_tile, Fp), lambda nt, et: (nt, 0)),   # node features (bf16)
            pl.BlockSpec((edge_tile, Fp), lambda nt, et: (et, 0)),   # two-way edge feats (bf16)
            pl.BlockSpec((Fp, Hp), lambda nt, et: (0, 0)),           # W1 (agg half), resident
            pl.BlockSpec((Fp, Hp), lambda nt, et: (0, 0)),           # W1 (node half), resident
            pl.BlockSpec((1, Hp), lambda nt, et: (0, 0)),            # b1
            pl.BlockSpec((Hp, Fop), lambda nt, et: (0, 0)),          # W2, resident
            pl.BlockSpec((1, Fop), lambda nt, et: (0, 0)),           # b2
        ],
        out_specs=pl.BlockSpec((node_tile, Fop), lambda nt, et: (nt, 0)),
        scratch_shapes=[
            pltpu.VMEM((node_tile, 1), jnp.float32),    # running max  m
            pltpu.VMEM((node_tile, 1), jnp.float32),    # running sum  l
            pltpu.VMEM((node_tile, Fp), jnp.float32),   # weighted-edge accumulator
        ],
        compiler_params=pltpu.CompilerParams(
            dimension_semantics=("parallel", "arbitrary"),
            vmem_limit_bytes=32 * 1024 * 1024),
    )(idx_p, node_p, edge_p, w1a, w1b, b1p, w2p, b2p)

    x = out_p[:N, :Fout]
    # Data(x=x, edge_attr=edge_attr, edge_index=edge_index, face=face)
    return {"x": x, "edge_attr": edge_attr, "edge_index": edge_index}


# ----------------------------- references -----------------------------------------------

def ref_forward_f32(node_attr, edge_index, edge_attr, params):
    """Pure-f32 JAX reference of the attention branch (true semantics)."""
    N, F = node_attr.shape
    twoway_edge = jnp.concatenate([edge_attr[:, :F], edge_attr[:, F:]], axis=0)
    senders, receivers = edge_index
    idx = jnp.concatenate([receivers, senders], axis=0)
    src = jnp.sum(twoway_edge * node_attr[idx], axis=1) / jnp.sqrt(jnp.float32(F))
    seg_max = jax.ops.segment_max(src, idx, num_segments=N)
    p = jnp.exp(src - seg_max[idx])
    seg_sum = jax.ops.segment_sum(p, idx, num_segments=N)
    factor = (p / seg_sum[idx])[:, None]
    agg = jax.ops.segment_sum(twoway_edge * factor, idx, num_segments=N)
    w1, b1, w2, b2 = params
    feat = jnp.concatenate([agg, node_attr], axis=1)
    h = jnp.maximum(feat @ w1 + b1, 0.0)
    return h @ w2 + b2


def ref_forward_bf16(node_attr, edge_index, edge_attr, params):
    """Reference that mirrors the kernel numerics: bf16 MXU operands, f32 softmax math."""
    N, F = node_attr.shape
    bf = lambda a: a.astype(jnp.bfloat16).astype(jnp.float32)
    twoway_edge = bf(jnp.concatenate([edge_attr[:, :F], edge_attr[:, F:]], axis=0))
    node_b = bf(node_attr)
    senders, receivers = edge_index
    idx = jnp.concatenate([receivers, senders], axis=0)
    src = jnp.sum(twoway_edge * node_b[idx], axis=1) * (1.0 / math.sqrt(F))
    seg_max = jax.ops.segment_max(src, idx, num_segments=N)
    p = jnp.exp(src - seg_max[idx])
    seg_sum = jax.ops.segment_sum(p, idx, num_segments=N)
    agg_num = jax.ops.segment_sum(bf(p)[:, None] * twoway_edge, idx, num_segments=N)
    agg = jnp.where(seg_sum[:, None] > 0, agg_num / seg_sum[:, None], 0.0)
    w1, b1, w2, b2 = params
    mm = lambda a, b: jnp.dot(a.astype(jnp.bfloat16), b.astype(jnp.bfloat16),
                              preferred_element_type=jnp.float32)
    h = jnp.maximum(mm(agg, w1[:F]) + mm(node_attr, w1[F:]) + b1, 0.0)
    return mm(h, w2) + b2


if __name__ == "__main__":
    # small graph: N nodes, E directed edges, feature size F, MLP hidden H
    N, E, F, H = 200, 320, 32, 64      # -> 2 node tiles x 5 edge tiles at 128/128
    Fout = F

    key = jax.random.PRNGKey(0)
    k_node, k_edge, k_idx, k_w1, k_b1, k_w2, k_b2 = jax.random.split(key, 7)

    node_attr = jax.random.normal(k_node, (N, F), dtype=jnp.float32)
    edge_attr = jax.random.normal(k_edge, (E, 2 * F), dtype=jnp.float32)
    edge_index = jax.random.randint(k_idx, (2, E), 0, N, dtype=jnp.int32)  # [senders; receivers]

    # deterministic params for self.net: Linear(2F -> H) + ReLU + Linear(H -> Fout)
    w1 = jax.random.normal(k_w1, (2 * F, H), jnp.float32) * (1.0 / math.sqrt(2 * F))
    b1 = jax.random.normal(k_b1, (1, H), jnp.float32) * 0.01
    w2 = jax.random.normal(k_w2, (H, Fout), jnp.float32) * (1.0 / math.sqrt(H))
    b2 = jax.random.normal(k_b2, (1, Fout), jnp.float32) * 0.01
    params = (w1, b1, w2, b2)

    out = node_block_forward(node_attr, edge_index, edge_attr, params)
    x = jax.block_until_ready(out["x"])
    assert x.shape == (N, Fout)
    assert bool(jnp.all(jnp.isfinite(x)))

    # tight check vs a reference using the same bf16-on-MXU numerics
    x_bf = ref_forward_bf16(node_attr, edge_index, edge_attr, params)
    assert jnp.allclose(x, x_bf, rtol=3e-2, atol=3e-2), \
        f"bf16-matched ref mismatch: max abs err {jnp.max(jnp.abs(x - x_bf))}"
    # looser sanity check vs the pure-f32 reference (bf16 MXU operands => ~1e-2 agreement)
    x_f32 = ref_forward_f32(node_attr, edge_index, edge_attr, params)
    assert jnp.allclose(x, x_f32, rtol=6e-2, atol=6e-2), \
        f"f32 ref mismatch: max abs err {jnp.max(jnp.abs(x - x_f32))}"

    # TODO(synk): attention=False branch (cell/face-based scatter_mean aggregation) is not
    # implemented; only the default attention=True path is exercised.
    print("KERNEL_OK")
</pallas_src>

<mosaic_0001>
module attributes {stable_mosaic.version = 11 : i64} {
  func.func @node_block_kernel(%arg0: i32, %arg1: i32, %arg2: memref<1x128xi32, #tpu.memory_space<vmem>>, %arg3: memref<128x128xbf16, #tpu.memory_space<vmem>>, %arg4: memref<128x128xbf16, #tpu.memory_space<vmem>>, %arg5: memref<128x128xbf16, #tpu.memory_space<vmem>>, %arg6: memref<128x128xbf16, #tpu.memory_space<vmem>>, %arg7: memref<1x128xf32, #tpu.memory_space<vmem>>, %arg8: memref<128x128xbf16, #tpu.memory_space<vmem>>, %arg9: memref<1x128xf32, #tpu.memory_space<vmem>>, %arg10: memref<128x128xf32, #tpu.memory_space<vmem>>, %arg11: memref<128x1xf32, #tpu.memory_space<vmem>>, %arg12: memref<128x1xf32, #tpu.memory_space<vmem>>, %arg13: memref<128x128xf32, #tpu.memory_space<vmem>>) attributes {dimension_semantics = [#tpu.dimension_semantics<parallel>, #tpu.dimension_semantics<arbitrary>], iteration_bounds = array<i64: 2, 5>, scalar_prefetch = 0 : i64, scratch_operands = 3 : i64, tpu.core_type = #tpu.core_type<tc>, window_params = [{transform_indices = @transform_0, window_bounds = array<i64: 1, 128>}, {transform_indices = @transform_1, window_bounds = array<i64: 128, 128>}, {transform_indices = @transform_2, window_bounds = array<i64: 128, 128>}, {pipeline_mode = #tpu.pipeline_mode<synchronous>, transform_indices = @transform_3, window_bounds = array<i64: 128, 128>}, {pipeline_mode = #tpu.pipeline_mode<synchronous>, transform_indices = @transform_4, window_bounds = array<i64: 128, 128>}, {pipeline_mode = #tpu.pipeline_mode<synchronous>, transform_indices = @transform_5, window_bounds = array<i64: 1, 128>}, {pipeline_mode = #tpu.pipeline_mode<synchronous>, transform_indices = @transform_6, window_bounds = array<i64: 128, 128>}, {pipeline_mode = #tpu.pipeline_mode<synchronous>, transform_indices = @transform_7, window_bounds = array<i64: 1, 128>}, {transform_indices = @transform_8, window_bounds = array<i64: 128, 128>}]} {
    %c0_i32 = arith.constant 0 : i32
    %0 = arith.cmpi eq, %arg1, %c0_i32 : i32
    %1 = arith.extui %0 : i1 to i32
    %c0_i32_0 = arith.constant 0 : i32
    %2 = arith.cmpi ne, %1, %c0_i32_0 : i32
    scf.if %2 {
      %cst_25 = arith.constant -1.000000e+30 : f32
      %45 = vector.broadcast %cst_25 : f32 to vector<128x1xf32>
      %c0_26 = arith.constant 0 : index
      %c0_27 = arith.constant 0 : index
      %46 = vector.load %arg11[%c0_26, %c0_27] : memref<128x1xf32, #tpu.memory_space<vmem>>, vector<128x1xf32>
      tpu.vector_store %arg11[%c0_26, %c0_27], %45 {strides = array<i32>} : memref<128x1xf32, #tpu.memory_space<vmem>>, vector<128x1xf32>,
      %cst_28 = arith.constant 0.000000e+00 : f32
      %47 = vector.broadcast %cst_28 : f32 to vector<128x1xf32>
      %c0_29 = arith.constant 0 : index
      %c0_30 = arith.constant 0 : index
      %48 = vector.load %arg12[%c0_29, %c0_30] : memref<128x1xf32, #tpu.memory_space<vmem>>, vector<128x1xf32>
      tpu.vector_store %arg12[%c0_29, %c0_30], %47 {strides = array<i32>} : memref<128x1xf32, #tpu.memory_space<vmem>>, vector<128x1xf32>,
      %cst_31 = arith.constant 0.000000e+00 : f32
      %49 = vector.broadcast %cst_31 : f32 to vector<128x128xf32>
      %c0_32 = arith.constant 0 : index
      %c0_33 = arith.constant 0 : index
      %50 = vector.load %arg13[%c0_32, %c0_33] : memref<128x128xf32, #tpu.memory_space<vmem>>, vector<128x128xf32>
      tpu.vector_store %arg13[%c0_32, %c0_33], %49 {strides = array<i32>} : memref<128x128xf32, #tpu.memory_space<vmem>>, vector<128x128xf32>,
    } else {
    }
    %c0 = arith.constant 0 : index
    %c0_1 = arith.constant 0 : index
    %3 = vector.load %arg3[%c0, %c0_1] : memref<128x128xbf16, #tpu.memory_space<vmem>>, vector<128x128xbf16>
    %c0_2 = arith.constant 0 : index
    %c0_3 = arith.constant 0 : index
    %4 = vector.load %arg4[%c0_2, %c0_3] : memref<128x128xbf16, #tpu.memory_space<vmem>>, vector<128x128xbf16>
    %c0_4 = arith.constant 0 : index
    %c0_5 = arith.constant 0 : index
    %5 = vector.load %arg2[%c0_4, %c0_5] : memref<1x128xi32, #tpu.memory_space<vmem>>, vector<1x128xi32>
    %6 = tpu.iota {dimensions = array<i32: 0>} : vector<128x128xi32>
    %c128_i32 = arith.constant 128 : i32
    %7 = arith.muli %arg0, %c128_i32 : i32
    %8 = vector.broadcast %7 : i32 to vector<128x128xi32>
    %9 = arith.addi %6, %8 : vector<128x128xi32>
    %10 = vector.broadcast %5 : vector<1x128xi32> to vector<128x128xi32>
    %11 = arith.cmpi eq, %9, %10 : vector<128x128xi32>
    %cst = arith.constant dense<0.000000e+00> : vector<128x128xf32>
    %12 = tpu.matmul %3, %4, %cst {dimension_numbers = #tpu.dot_dimension_numbers<[1], [1], [0], [0], [0, 0, 1, 0], [], []>} : vector<128x128xbf16>, vector<128x128xbf16>, vector<128x128xf32> -> vector<128x128xf32>
    %cst_6 = arith.constant 0.176776692 : f32
    %13 = vector.broadcast %cst_6 : f32 to vector<128x128xf32>
    %14 = arith.mulf %12, %13 : vector<128x128xf32>
    %cst_7 = arith.constant -1.000000e+30 : f32
    %15 = vector.broadcast %cst_7 : f32 to vector<128x128xf32>
    %16 = arith.select %11, %14, %15 : vector<128x128xi1>, vector<128x128xf32>
    %c0_8 = arith.constant 0 : index
    %c0_9 = arith.constant 0 : index
    %17 = vector.load %arg11[%c0_8, %c0_9] : memref<128x1xf32, #tpu.memory_space<vmem>>, vector<128x1xf32>
    %cst_10 = arith.constant dense<0xFF800000> : vector<128xf32>
    %18 = vector.multi_reduction <maximumf>, %16, %cst_10 [1] : vector<128x128xf32> to vector<128xf32>
    %19 = vector.shape_cast %18 : vector<128xf32> to vector<128x1xf32>
    %20 = arith.maximumf %17, %19 : vector<128x1xf32>
    %21 = arith.subf %17, %20 : vector<128x1xf32>
    %22 = math.exp %21 : vector<128x1xf32>
    %23 = vector.broadcast %20 : vector<128x1xf32> to vector<128x128xf32>
    %24 = arith.subf %16, %23 : vector<128x128xf32>
    %25 = math.exp %24 : vector<128x128xf32>
    %cst_11 = arith.constant 0.000000e+00 : f32
    %26 = vector.broadcast %cst_11 : f32 to vector<128x128xf32>
    %27 = arith.select %11, %25, %26 : vector<128x128xi1>, vector<128x128xf32>
    %c0_12 = arith.constant 0 : index
    %c0_13 = arith.constant 0 : index
    %28 = vector.load %arg12[%c0_12, %c0_13] : memref<128x1xf32, #tpu.memory_space<vmem>>, vector<128x1xf32>
    %29 = arith.mulf %22, %28 : vector<128x1xf32>
    %cst_14 = arith.constant dense<0.000000e+00> : vector<128xf32>
    %30 = vector.multi_reduction <add>, %27, %cst_14 [1] : vector<128x128xf32> to vector<128xf32>
    %31 = vector.shape_cast %30 : vector<128xf32> to vector<128x1xf32>
    %32 = arith.addf %29, %31 : vector<128x1xf32>
    %c0_15 = arith.constant 0 : index
    %c0_16 = arith.constant 0 : index
    %33 = vector.load %arg12[%c0_15, %c0_16] : memref<128x1xf32, #tpu.memory_space<vmem>>, vector<128x1xf32>
    tpu.vector_store %arg12[%c0_15, %c0_16], %32 {strides = array<i32>} : memref<128x1xf32, #tpu.memory_space<vmem>>, vector<128x1xf32>,
    %c0_17 = arith.constant 0 : index
    %c0_18 = arith.constant 0 : index
    %34 = vector.load %arg13[%c0_17, %c0_18] : memref<128x128xf32, #tpu.memory_space<vmem>>, vector<128x128xf32>
    %35 = vector.broadcast %22 : vector<128x1xf32> to vector<128x128xf32>
    %36 = arith.mulf %35, %34 : vector<128x128xf32>
    %37 = arith.truncf %27 : vector<128x128xf32> to vector<128x128xbf16>
    %cst_19 = arith.constant dense<0.000000e+00> : vector<128x128xf32>
    %38 = tpu.matmul %37, %4, %cst_19 {dimension_numbers = #tpu.dot_dimension_numbers<[1], [0], [0], [1], [0, 0, 1, 1], [], []>} : vector<128x128xbf16>, vector<128x128xbf16>, vector<128x128xf32> -> vector<128x128xf32>
    %39 = arith.addf %36, %38 : vector<128x128xf32>
    %c0_20 = arith.constant 0 : index
    %c0_21 = arith.constant 0 : index
    %40 = vector.load %arg13[%c0_20, %c0_21] : memref<128x128xf32, #tpu.memory_space<vmem>>, vector<128x128xf32>
    tpu.vector_store %arg13[%c0_20, %c0_21], %39 {strides = array<i32>} : memref<128x128xf32, #tpu.memory_space<vmem>>, vector<128x128xf32>,
    %c0_22 = arith.constant 0 : index
    %c0_23 = arith.constant 0 : index
    %41 = vector.load %arg11[%c0_22, %c0_23] : memref<128x1xf32, #tpu.memory_space<vmem>>, vector<128x1xf32>
    tpu.vector_store %arg11[%c0_22, %c0_23], %20 {strides = array<i32>} : memref<128x1xf32, #tpu.memory_space<vmem>>, vector<128x1xf32>,
    %c4_i32 = arith.constant 4 : i32
    %42 = arith.cmpi eq, %arg1, %c4_i32 : i32
    %43 = arith.extui %42 : i1 to i32
    %c0_i32_24 = arith.constant 0 : i32
    %44 = arith.cmpi ne, %43, %c0_i32_24 : i32
    scf.if %44 {
      %c0_25 = arith.constant 0 : index
      %c0_26 = arith.constant 0 : index
      %45 = vector.load %arg12[%c0_25, %c0_26] : memref<128x1xf32, #tpu.memory_space<vmem>>, vector<128x1xf32>
      %cst_27 = arith.constant 0.000000e+00 : f32
      %46 = vector.broadcast %cst_27 : f32 to vector<128x1xf32>
      %47 = arith.cmpf ogt, %45, %46 : vector<128x1xf32>
      %48 = tpu.reciprocal %45 {approx = true} : vector<128x1xf32> -> vector<128x1xf32>
      %cst_28 = arith.constant 0.000000e+00 : f32
      %49 = vector.broadcast %cst_28 : f32 to vector<128x1xf32>
      %50 = arith.select %47, %48, %49 : vector<128x1xi1>, vector<128x1xf32>
      %c0_29 = arith.constant 0 : index
      %c0_30 = arith.constant 0 : index
      %51 = vector.load %arg13[%c0_29, %c0_30] : memref<128x128xf32, #tpu.memory_space<vmem>>, vector<128x128xf32>
      %52 = vector.broadcast %50 : vector<128x1xf32> to vector<128x128xf32>
      %53 = arith.mulf %51, %52 : vector<128x128xf32>
      %54 = arith.truncf %53 : vector<128x128xf32> to vector<128x128xbf16>
      %c0_31 = arith.constant 0 : index
      %c0_32 = arith.constant 0 : index
      %55 = vector.load %arg5[%c0_31, %c0_32] : memref<128x128xbf16, #tpu.memory_space<vmem>>, vector<128x128xbf16>
      %cst_33 = arith.constant dense<0.000000e+00> : vector<128x128xf32>
      %56 = tpu.matmul %54, %55, %cst_33 {dimension_numbers = #tpu.dot_dimension_numbers<[1], [0], [0], [1], [0, 0, 1, 1], [], []>} : vector<128x128xbf16>, vector<128x128xbf16>, vector<128x128xf32> -> vector<128x128xf32>
      %c0_34 = arith.constant 0 : index
      %c0_35 = arith.constant 0 : index
      %57 = vector.load %arg6[%c0_34, %c0_35] : memref<128x128xbf16, #tpu.memory_space<vmem>>, vector<128x128xbf16>
      %cst_36 = arith.constant dense<0.000000e+00> : vector<128x128xf32>
      %58 = tpu.matmul %3, %57, %cst_36 {dimension_numbers = #tpu.dot_dimension_numbers<[1], [0], [0], [1], [0, 0, 1, 1], [], []>} : vector<128x128xbf16>, vector<128x128xbf16>, vector<128x128xf32> -> vector<128x128xf32>
      %59 = arith.addf %56, %58 : vector<128x128xf32>
      %c0_37 = arith.constant 0 : index
      %c0_38 = arith.constant 0 : index
      %60 = vector.load %arg7[%c0_37, %c0_38] : memref<1x128xf32, #tpu.memory_space<vmem>>, vector<1x128xf32>
      %61 = vector.broadcast %60 : vector<1x128xf32> to vector<128x128xf32>
      %62 = arith.addf %59, %61 : vector<128x128xf32>
      %cst_39 = arith.constant 0.000000e+00 : f32
      %63 = vector.broadcast %cst_39 : f32 to vector<128x128xf32>
      %64 = arith.maximumf %62, %63 : vector<128x128xf32>
      %65 = arith.truncf %64 : vector<128x128xf32> to vector<128x128xbf16>
      %c0_40 = arith.constant 0 : index
      %c0_41 = arith.constant 0 : index
      %66 = vector.load %arg8[%c0_40, %c0_41] : memref<128x128xbf16, #tpu.memory_space<vmem>>, vector<128x128xbf16>
      %cst_42 = arith.constant dense<0.000000e+00> : vector<128x128xf32>
      %67 = tpu.matmul %65, %66, %cst_42 {dimension_numbers = #tpu.dot_dimension_numbers<[1], [0], [0], [1], [0, 0, 1, 1], [], []>} : vector<128x128xbf16>, vector<128x128xbf16>, vector<128x128xf32> -> vector<128x128xf32>
      %c0_43 = arith.constant 0 : index
      %c0_44 = arith.constant 0 : index
      %68 = vector.load %arg9[%c0_43, %c0_44] : memref<1x128xf32, #tpu.memory_space<vmem>>, vector<1x128xf32>
      %69 = vector.broadcast %68 : vector<1x128xf32> to vector<128x128xf32>
      %70 = arith.addf %67, %69 : vector<128x128xf32>
      %c0_45 = arith.constant 0 : index
      %c0_46 = arith.constant 0 : index
      %71 = vector.load %arg10[%c0_45, %c0_46] : memref<128x128xf32, #tpu.memory_space<vmem>>, vector<128x128xf32>
      tpu.vector_store %arg10[%c0_45, %c0_46], %70 {strides = array<i32>} : memref<128x128xf32, #tpu.memory_space<vmem>>, vector<128x128xf32>,
    } else {
    }
    return
  }
  func.func @transform_0(%arg0: i32, %arg1: i32) -> (i32, i32) {
    %c0_i32 = arith.constant 0 : i32
    %c0_i32_0 = arith.constant 0 : i32
    return %c0_i32, %arg1 : i32, i32
  }
  func.func @transform_1(%arg0: i32, %arg1: i32) -> (i32, i32) {
    %c0_i32 = arith.constant 0 : i32
    %c0_i32_0 = arith.constant 0 : i32
    return %arg0, %c0_i32 : i32, i32
  }
  func.func @transform_2(%arg0: i32, %arg1: i32) -> (i32, i32) {
    %c0_i32 = arith.constant 0 : i32
    %c0_i32_0 = arith.constant 0 : i32
    return %arg1, %c0_i32 : i32, i32
  }
  func.func @transform_3(%arg0: i32, %arg1: i32) -> (i32, i32) {
    %c0_i32 = arith.constant 0 : i32
    %c0_i32_0 = arith.constant 0 : i32
    %c0_i32_1 = arith.constant 0 : i32
    return %c0_i32, %c0_i32_0 : i32, i32
  }
  func.func @transform_4(%arg0: i32, %arg1: i32) -> (i32, i32) {
    %c0_i32 = arith.constant 0 : i32
    %c0_i32_0 = arith.constant 0 : i32
    %c0_i32_1 = arith.constant 0 : i32
    return %c0_i32, %c0_i32_0 : i32, i32
  }
  func.func @transform_5(%arg0: i32, %arg1: i32) -> (i32, i32) {
    %c0_i32 = arith.constant 0 : i32
    %c0_i32_0 = arith.constant 0 : i32
    %c0_i32_1 = arith.constant 0 : i32
    return %c0_i32, %c0_i32_0 : i32, i32
  }
  func.func @transform_6(%arg0: i32, %arg1: i32) -> (i32, i32) {
    %c0_i32 = arith.constant 0 : i32
    %c0_i32_0 = arith.constant 0 : i32
    %c0_i32_1 = arith.constant 0 : i32
    return %c0_i32, %c0_i32_0 : i32, i32
  }
  func.func @transform_7(%arg0: i32, %arg1: i32) -> (i32, i32) {
    %c0_i32 = arith.constant 0 : i32
    %c0_i32_0 = arith.constant 0 : i32
    %c0_i32_1 = arith.constant 0 : i32
    return %c0_i32, %c0_i32_0 : i32, i32
  }
  func.func @transform_8(%arg0: i32, %arg1: i32) -> (i32, i32) {
    %c0_i32 = arith.constant 0 : i32
    %c0_i32_0 = arith.constant 0 : i32
    return %arg0, %c0_i32 : i32, i32
  }
}

</mosaic_0001>

<bundles_post_ra>
// kernel: tpu_custom_call.1
= control target key start
LH: loop header
LB: loop body
LE: loop exit
PB: predicated region body
PF: predicated region fallthrough
CT: control target
= control target key end

     0   :  { %s4043_s0 = inlined_call_operand.hbm [shape: s32[1,640], index: 0, kind: input, shape index: {}]   ;;  %s4044_s1 = inlined_call_operand.hbm [shape: bf16[256,128], index: 1, kind: input, shape index: {}]   ;;  %s4045_s2 = inlined_call_operand.hbm [shape: bf16[640,128], index: 2, kind: input, shape index: {}]   ;;  %s4046_s3 = inlined_call_operand.hbm [shape: bf16[128,128], index: 3, kind: input, shape index: {}]   ;;  %s4047_s4 = inlined_call_operand.hbm [shape: bf16[128,128], index: 4, kind: input, shape index: {}]   ;;  %s4048_s5 = inlined_call_operand.vmem [shape: f32[1,128], index: 5, kind: input, shape index: {}]   ;;  %s4049_s6 = inlined_call_operand.hbm [shape: bf16[128,128], index: 6, kind: input, shape index: {}]   ;;  %s4050_s7 = inlined_call_operand.vmem [shape: f32[1,128], index: 7, kind: input, shape index: {}]   ;;  %s4051_s8 = inlined_call_operand.hbm [shape: f32[256,128], index: 8, kind: output, shape index: {}]  }
   0x1   :  { %4083 = sst [smem:[#allocation44_spill]] %s4043_s0 }
   0x2   :  { %4084 = sst [smem:[#allocation45_spill]] %s4044_s1 }
   0x3   :  { %4085 = sst [smem:[#allocation46_spill]] %s4046_s3 }
   0x4   :  { %4086 = sst [smem:[#allocation47_spill]] %s4047_s4 }
   0x5   :  { %4087 = sst [smem:[#allocation48_spill]] %s4048_s5 }
   0x6   :  { %4088 = sst [smem:[#allocation49_spill]] %s4049_s6 }
   0x7   :  { %4089 = sst [smem:[#allocation50_spill]] %s4050_s7 }
   0x8   :  { %4090 = sst [smem:[#allocation51_spill]] %s4051_s8 }
   0x9   :  { %13 = vsyncpa [#allocation6], 0 }
   0xa   :  { %15 = vsyncpa [#allocation6 + $0x1], 0 }
   0xb   :  { %16 = vsyncpa [#allocation9], 0 }
   0xc   :  { %18 = vsyncpa [#allocation9 + $0x1], 0 }
   0xd   :  { %19 = vsyncpa [#allocation12], 0 }
   0xe   :  { %20 = vsyncpa [#allocation15], 0 }
   0xf   :  { %21 = vsyncpa [#allocation7], 0 }
  0x10   :  { %23 = vsyncpa [#allocation7 + $0x1], 0  ;;  %s3036_s27 = smov 0   ;;  %s3038_s28 = smov 0  }
  0x11   :  { %s3040_s29 = smov 0   ;;  %s3042_s30 = smov 0  }
  0x12   :  { %s3044_s9 = smov 0   ;;  %s3046_s10 = smov 0  }
  0x13   :  { %s3048_s11 = smov 0   ;;  %s3050_s12 = smov 0  }
  0x14   :  { %s3052_s13 = smov 0   ;;  %s3054_s14 = smov 0  }
  0x15   :  { %s3056_s15 = smov 0  }
  0x16 LB: > { %4091 = sst [smem:[#allocation23_spill]] %s2938_s27  ;;  %s3092_s16 = sadd.s32 4294967295, %s2978_s15   ;;  %s2978_s15 = sphi %s3056_s15, %s29_s15   ;;  %s2974_s14 = sphi %s3054_s14, %s4176_s14   ;;  %s2970_s13 = sphi %s3052_s13, %s4184_s13   ;;  %s2966_s12 = sphi %s3050_s12, %s4174_s12   ;;  %s2962_s11 = sphi %s3048_s11, %s4183_s11   ;;  %s2958_s10 = sphi %s3046_s10, %s4182_s10   ;;  %s2954_s9 = sphi %s3044_s9, %s4181_s9   ;;  %s2950_s30 = sphi %s3042_s30, %s4180_s30   ;;  %s2946_s29 = sphi %s3040_s29, %s4179_s29   ;;  %s2942_s28 = sphi %s3038_s28, %s4178_s28   ;;  %s2938_s27 = sphi %s3036_s27, %s4177_s27  }
  0x17   : > { %4092 = sst [smem:[#allocation24_spill]] %s2966_s12  ;;  %p2111_p0 = scmp.ge.s32.totalorder %s2978_s15, 1 }
  0x18   : > { %4093 = sst [smem:[#allocation25_spill]] %s2974_s14  ;;  %p62_p1 = scmp.eq.s32.totalorder %s3092_s16, 0 }
  0x19   : > { %p242_p2 = scmp.eq.s32.totalorder %s3092_s16, 9  ;;  %p255_p3 = scmp.lt.s32.totalorder %s2978_s15, 11 }
  0x1a   : > { %s4094_s3 = sld [smem:[#allocation46_spill]]  ;;  %s2980_s21 = smov [#allocation11]  }
  0x1b   : > { %p3101_p4 = pnand %p2111_p0, %p255_p3  ;;  %s268_s22 = sshll.u32 %s2980_s21, 4  ;;  %s269_s22 = int_to_ptr.vmem [resolvable:$true] %s268_s22 }
  0x1c   : > { %s4052_s24 = smov 64   ;;  %s4054_s25 = smov 4  }
  0x1d   : > { %p2424_p5 = pneg %p3101_p4  ;;  %s2110_s26 = sadd.s32 4294967294, %s2978_s15  }
  0x1e   : > { %p56_p7 = scmp.eq.s32.totalorder %s2978_s15, 0  ;;  %p81_p8 = scmp.ne.s32.totalorder %s2946_s29, %s2942_s28 }
  0x1f   : > { %p3109_p6 = pnand %p2424_p5, %p62_p1  ;;  %p87_p9 = scmp.ne.s32.totalorder %s2942_s28, %s2938_s27 }
  0x20   : > { %s266_s19 = sshll.u32 %s4094_s3, 4  ;;  %p248_p10 = scmp.eq.s32.totalorder %s2110_s26, 9  ;;  %s267_s19 = int_to_ptr.hbm [resolvable:$true] %s266_s19 }
  0x21   : > { %2427 = dma.hbm_to_vmem [thread:$0]  (!%p3109_p6), %s267_s19, 1024, %s269_s22, [#allocation12], %s4052_s24, %s4052_s24, %s4054_s25  }
  0x22   : > { %p2451_p11 = scmp.lt.s32.totalorder %s2978_s15, 10  ;;  %p3129_p12 = por %p81_p8, %p56_p7 }
  0x23   : > { %p3135_p13 = por %p87_p9, %p62_p1  ;;  %p3141_p0 = por %p242_p2, %p81_p8 }
  0x24   : > { %p3145_p3 = por %p248_p10, %p87_p9  ;;  %s333_s26 = sand.u32 1, %s2978_s15  }
  0x25   : > { %s4099_s19 = scalar_select %p3141_p0, 1, 0 }
  0x26   : > { %s4101_s22 = scalar_select %p3145_p3, 1, 0 }
  0x27   : > { %4100 = sst [smem:[#allocation26_spill]] %s4099_s19  ;;  %s335_s18 = sand.u32 1, %s2946_s29  }
  0x28   : > { %4102 = sst [smem:[#allocation27_spill]] %s4101_s22  ;;  %s2116_s17 = sshll.u32 %s335_s18, 6 }
  0x29   : > { %s2321_s24 = sshll.u32 %s2974_s14, 6  ;;  %s4103_s1 = sld [smem:[#allocation45_spill]] }
  0x2a   : > { %s337_s7 = scalar_lea.vmem [#allocation8], %s2116_s17  ;;  %p2438_p2 = pnand %p2451_p11, %p3129_p12 }
  0x2b   : > { %s345_s5 = sshll.u32 %s337_s7, 4  ;;  %s4104_s4 = sld [smem:[#allocation47_spill]]  ;;  %s346_s5 = int_to_ptr.vmem [resolvable:$true] %s345_s5 }
  0x2c   : > { %s3162_s27 = scalar_lea.sflag [#allocation9], %s333_s26  ;;  %s4106_s7 = smov 64  }
  0x2d   : > { %s4107_s6 = sld [smem:[#allocation49_spill]]  ;;  %s2984_s22 = smov [#allocation14]  }
  0x2e   : > { %s48_s26 = sadd.s32 1, %s2958_s10  ;;  %p55_p8 = scmp.ne.s32.totalorder %s2958_s10, %s2954_s9 }
  0x2f   : > { %s342_s8 = scalar_lea.hbm %s4103_s1, %s2321_s24  ;;  %s4105_s24 = smov 4  }
  0x30   : > { %s343_s12 = sshll.u32 %s342_s8, 4  ;;  %s2983_s8 = smov [#allocation13]   ;;  %s344_s12 = int_to_ptr.hbm [resolvable:$true] %s343_s12 }
  0x31   : > { %s280_s18 = sshll.u32 %s4104_s4, 4  ;;  %s282_s25 = sshll.u32 %s2983_s8, 4  ;;  %s281_s18 = int_to_ptr.hbm [resolvable:$true] %s280_s18  ;;  %s283_s25 = int_to_ptr.vmem [resolvable:$true] %s282_s25 }
  0x32   : > { %2440 = dma.hbm_to_vmem [thread:$0]  (!%p2438_p2), %s344_s12, 1024, %s346_s5, %s3162_s27, %s4106_s7, %s4106_s7, %s4105_s24  }
  0x33   : > { %s297_s19 = sshll.u32 %s4107_s6, 4  ;;  %s299_s5 = sshll.u32 %s2984_s22, 4  ;;  %s298_s19 = int_to_ptr.hbm [resolvable:$true] %s297_s19  ;;  %s300_s5 = int_to_ptr.vmem [resolvable:$true] %s299_s5 }
  0x34   : > { %2430 = dma.hbm_to_vmem [thread:$0]  (!%p3109_p6), %s281_s18, 1024, %s283_s25, [#allocation12], %s4106_s7, %s4106_s7, %s4105_s24  }
  0x35   : > { %2433 = dma.hbm_to_vmem [thread:$0]  (!%p3109_p6), %s298_s19, 1024, %s300_s5, [#allocation15], %s4106_s7, %s4106_s7, %s4105_s24  }
  0x36   : > { %s38_s12 = sadd.s32 1, %s2970_s13  ;;  %p61_p9 = scmp.ne.s32.totalorder %s2954_s9, %s2950_s30 }
  0x37   : > { %p39_p5 = scmp.ge.s32.totalorder %s38_s12, 5  ;;  %s4109_s18 = sadd.s32 1, %s2974_s14 }
  0x38   : > { %p3196_p10 = por %p56_p7, %p55_p8  ;;  %p3202_p2 = por %p62_p1, %p61_p9 }
  0x39   : > { %s4186_s12 = smov (%p39_p5, %s38_s12), 0  ;;  %s4188_s18 = smov (!%p39_p5, %s4109_s18), %s2974_s14 }
  0x3a   : > { %4108 = sst [smem:[#allocation28_spill]] %s4186_s12  ;;  %s45_s23 = ssub.s32 %s2970_s13, %s4186_s12 }
  0x3b   : > { %p43_p6 = scmp.ge.s32.totalorder %s4188_s18, 2  ;;  %p46_p12 = scmp.eq.s32.totalorder %s45_s23, 0 }
  0x3c   : > { %s316_s25 = sand.u32 1, %s2958_s10   ;;  %s4114_s0 = sld [smem:[#allocation44_spill]] }
  0x3d   : > { %s4190_s18 = smov (%p43_p6, %s4188_s18), 0  ;;  %s319_s1 = scalar_lea.vmem [#allocation5], %s316_s25 }
  0x3e   : > { %4112 = sst [smem:[#allocation29_spill]] %s4190_s18  ;;  %s71_s21 = ssub.s32 %s2974_s14, %s4190_s18 }
  0x3f   : > { %s3210_s17 = scalar_select %p46_p12, %s2958_s10, %s48_s26  }
  0x40   : > { %p72_p7 = scmp.eq.s32.totalorder %s71_s21, 0  ;;  %s326_s23 = sshll.u32 %s319_s1, 4  ;;  %s327_s23 = int_to_ptr.vmem [resolvable:$true] %s326_s23 }
  0x41   : > { %4113 = sst [smem:[#allocation30_spill]] %s3210_s17  ;;  %s4115_s4 = sadd.s32 1, %s2946_s29 }
  0x42   : > { %s322_s5 = scalar_lea.hbm %s4114_s0, %s2970_s13  ;;  %p2435_p5 = pnand %p2451_p11, %p3196_p10 }
  0x43   : > { %s3221_s6 = scalar_select %p72_p7, %s2946_s29, %s4115_s4  }
  0x44   : > { %s324_s12 = sshll.u32 %s322_s5, 4  ;;  %s2119_s26 = sshll.u32 %s316_s25, 6  ;;  %s325_s12 = int_to_ptr.hbm [resolvable:$true] %s324_s12 }
  0x45   : > { %s2322_s17 = sshll.u32 %s2970_s13, 6  ;;  %s317_s18 = scalar_lea.sflag [#allocation6], %s316_s25 }
  0x46   : > { %2437 = dma.hbm_to_vmem [thread:$0]  (!%p2435_p5), %s325_s12, 16, %s327_s23, %s317_s18  }
  0x47   : > { %s359_s21 = scalar_lea.vmem [#allocation10], %s2119_s26  ;;  %s364_s1 = scalar_lea.hbm %s4045_s2, %s2322_s17 }
  0x48   : > { %s367_s14 = sshll.u32 %s359_s21, 4  ;;  %s365_s0 = sshll.u32 %s364_s1, 4  ;;  %s368_s14 = int_to_ptr.vmem [resolvable:$true] %s367_s14  ;;  %s366_s0 = int_to_ptr.hbm [resolvable:$true] %s365_s0 }
  0x49   : > { %2443 = dma.hbm_to_vmem [thread:$0]  (!%p2435_p5), %s366_s0, 1024, %s368_s14, %s3162_s27, %s4106_s7, %s4106_s7, %s4105_s24  }
  0x4a   : > { %379 = sbr.rel (%p3101_p4) target bundleno = 1344 (0x540), region = 52 }
  0x4f   : > { %s3238_s4 = sand.u32 1, %s2954_s9  }
  0x50   : > { %s382_s12 = scalar_lea.sflag [#allocation6], %s3238_s4  ;;  %s384_s18 = scalar_lea.vmem [#allocation5], %s3238_s4 }
  0x51   : > { %2913 = dma.done.wait (%p3202_p2), %s382_s12, 16  }
  0x52   : > { %2915 = vsyncadd (%p3202_p2), %s382_s12, 4294967280  ;;  %s390_s0 = sand.u32 1, %s3092_s16   ;;  %s3248_s14 = sand.u32 1, %s2942_s28  }
  0x53   : > { %s2123_s20 = sshll.u32 %s3248_s14, 6  ;;  %s391_s27 = scalar_lea.sflag [#allocation9], %s390_s0 }
  0x54   : > { %s3251_s24 = scalar_lea.vmem [#allocation8], %s2123_s20 }
  0x55   : > { %2917 = dma.done.wait (%p3135_p13), %s391_s27, 1024  }
  0x56   : > { %2919 = vsyncadd (%p3135_p13), %s391_s27, 4294966272  ;;  %s2124_s7 = sshll.u32 %s3238_s4, 6 }
  0x57   : > { %s3258_s8 = scalar_lea.vmem [#allocation10], %s2124_s7 }
  0x58   : > { %2921 = dma.done.wait (%p3202_p2), %s391_s27, 1024  }
  0x59   : > { %2923 = vsyncadd (%p3202_p2), %s391_s27, 4294966272 }
  0x5a   : > { %2925 = dma.done.wait (%p62_p1), [#allocation12], 2048  }
  0x5b   : > { %2927 = vsyncadd (%p62_p1), [#allocation12], 4294965248 }
  0x5c   : > { %2929 = dma.done.wait (%p62_p1), [#allocation15], 1024  }
  0x5d   : > { %2931 = vsyncadd (%p62_p1), [#allocation15], 4294966272  ;;  %s2128_s3 = sshll.u32 %s3248_s14, 7  ;;  %p2129_p4 = scmp.ne.s32.totalorder %s2962_s11, 0 }
  0x5e   : > { %s3273_s25 = scalar_lea.vmem [#allocation16], %s2128_s3 }
  0x5f   : > { %468 = sbr.rel (%p2129_p4) target bundleno = 149 (0x95), region = 80 }
  0x64   : > { %vm469_vm0 = vcmask 7168   ;;  %v2985_v0 = vmov -1e+30   ;;  %v2986_v1 = vmov 0.0  }
  0x65   : > { %470 = vst.msk [vmem:[#allocation2] sm:$0xff] %vm469_vm0, %v2985_v0 }
  0x66   : > { %471 = vst.msk [vmem:[#allocation2 + $0x8] sm:$0xff] %vm469_vm0, %v2985_v0 }
  0x67   : > { %472 = vst.msk [vmem:[#allocation2 + $0x10] sm:$0xff] %vm469_vm0, %v2985_v0 }
  0x68   : > { %473 = vst.msk [vmem:[#allocation2 + $0x18] sm:$0xff] %vm469_vm0, %v2985_v0 }
  0x69   : > { %474 = vst.msk [vmem:[#allocation2 + $0x20] sm:$0xff] %vm469_vm0, %v2985_v0 }
  0x6a   : > { %475 = vst.msk [vmem:[#allocation2 + $0x28] sm:$0xff] %vm469_vm0, %v2985_v0 }
  0x6b   : > { %476 = vst.msk [vmem:[#allocation2 + $0x30] sm:$0xff] %vm469_vm0, %v2985_v0 }
  0x6c   : > { %477 = vst.msk [vmem:[#allocation2 + $0x38] sm:$0xff] %vm469_vm0, %v2985_v0 }
  0x6d   : > { %478 = vst.msk [vmem:[#allocation2 + $0x40] sm:$0xff] %vm469_vm0, %v2985_v0 }
  0x6e   : > { %479 = vst.msk [vmem:[#allocation2 + $0x48] sm:$0xff] %vm469_vm0, %v2985_v0 }
  0x6f   : > { %480 = vst.msk [vmem:[#allocation2 + $0x50] sm:$0xff] %vm469_vm0, %v2985_v0 }
  0x70   : > { %481 = vst.msk [vmem:[#allocation2 + $0x58] sm:$0xff] %vm469_vm0, %v2985_v0 }
  0x71   : > { %482 = vst.msk [vmem:[#allocation2 + $0x60] sm:$0xff] %vm469_vm0, %v2985_v0 }
  0x72   : > { %483 = vst.msk [vmem:[#allocation2 + $0x68] sm:$0xff] %vm469_vm0, %v2985_v0 }
  0x73   : > { %484 = vst.msk [vmem:[#allocation2 + $0x70] sm:$0xff] %vm469_vm0, %v2985_v0 }
  0x74   : > { %485 = vst.msk [vmem:[#allocation2 + $0x78] sm:$0xff] %vm469_vm0, %v2985_v0 }
  0x75   : > { %486 = vst.msk [vmem:[#allocation3] sm:$0xff] %vm469_vm0, %v2986_v1 }
  0x76   : > { %487 = vst.msk [vmem:[#allocation3 + $0x8] sm:$0xff] %vm469_vm0, %v2986_v1 }
  0x77   : > { %488 = vst.msk [vmem:[#allocation3 + $0x10] sm:$0xff] %vm469_vm0, %v2986_v1 }
  0x78   : > { %489 = vst.msk [vmem:[#allocation3 + $0x18] sm:$0xff] %vm469_vm0, %v2986_v1 }
  0x79   : > { %490 = vst.msk [vmem:[#allocation3 + $0x20] sm:$0xff] %vm469_vm0, %v2986_v1 }
  0x7a   : > { %491 = vst.msk [vmem:[#allocation3 + $0x28] sm:$0xff] %vm469_vm0, %v2986_v1 }
  0x7b   : > { %492 = vst.msk [vmem:[#allocation3 + $0x30] sm:$0xff] %vm469_vm0, %v2986_v1 }
  0x7c   : > { %493 = vst.msk [vmem:[#allocation3 + $0x38] sm:$0xff] %vm469_vm0, %v2986_v1 }
  0x7d   : > { %494 = vst.msk [vmem:[#allocation3 + $0x40] sm:$0xff] %vm469_vm0, %v2986_v1 }
  0x7e   : > { %495 = vst.msk [vmem:[#allocation3 + $0x48] sm:$0xff] %vm469_vm0, %v2986_v1 }
  0x7f   : > { %496 = vst.msk [vmem:[#allocation3 + $0x50] sm:$0xff] %vm469_vm0, %v2986_v1 }
  0x80   : > { %497 = vst.msk [vmem:[#allocation3 + $0x58] sm:$0xff] %vm469_vm0, %v2986_v1 }
  0x81   : > { %498 = vst.msk [vmem:[#allocation3 + $0x60] sm:$0xff] %vm469_vm0, %v2986_v1 }
  0x82   : > { %499 = vst.msk [vmem:[#allocation3 + $0x68] sm:$0xff] %vm469_vm0, %v2986_v1 }
  0x83   : > { %500 = vst.msk [vmem:[#allocation3 + $0x70] sm:$0xff] %vm469_vm0, %v2986_v1 }
  0x84   : > { %501 = vst.msk [vmem:[#allocation3 + $0x78] sm:$0xff] %vm469_vm0, %v2986_v1 }
  0x85   : > { %502 = vst [vmem:[#allocation4 + $0x30] sm:$0xff] %v2986_v1 }
  0x86   : > { %503 = vst [vmem:[#allocation4] sm:$0xff] %v2986_v1 }
  0x87   : > { %504 = vst [vmem:[#allocation4 + $0x58] sm:$0xff] %v2986_v1 }
  0x88   : > { %505 = vst [vmem:[#allocation4 + $0x18] sm:$0xff] %v2986_v1 }
  0x89   : > { %506 = vst [vmem:[#allocation4 + $0x50] sm:$0xff] %v2986_v1 }
  0x8a   : > { %507 = vst [vmem:[#allocation4 + $0x68] sm:$0xff] %v2986_v1 }
  0x8b   : > { %508 = vst [vmem:[#allocation4 + $0x8] sm:$0xff] %v2986_v1 }
  0x8c   : > { %509 = vst [vmem:[#allocation4 + $0x48] sm:$0xff] %v2986_v1 }
  0x8d   : > { %510 = vst [vmem:[#allocation4 + $0x40] sm:$0xff] %v2986_v1 }
  0x8e   : > { %511 = vst [vmem:[#allocation4 + $0x20] sm:$0xff] %v2986_v1 }
  0x8f   : > { %512 = vst [vmem:[#allocation4 + $0x10] sm:$0xff] %v2986_v1 }
  0x90   : > { %513 = vst [vmem:[#allocation4 + $0x38] sm:$0xff] %v2986_v1 }
  0x91   : > { %514 = vst [vmem:[#allocation4 + $0x60] sm:$0xff] %v2986_v1 }
  0x92   : > { %515 = vst [vmem:[#allocation4 + $0x70] sm:$0xff] %v2986_v1 }
  0x93   : > { %516 = vst [vmem:[#allocation4 + $0x78] sm:$0xff] %v2986_v1 }
  0x94   : > { %517 = vst [vmem:[#allocation4 + $0x28] sm:$0xff] %v2986_v1 }
  0x95 PF: > { %v2338_v2 = vld [vmem:[%s3258_s8 + $0x38] sm:$0xff]  ;;  %v2337_v3 = vld [vmem:[%s3258_s8 + $0x30] sm:$0xff]  ;;  %v2336_v4 = vld [vmem:[%s3258_s8 + $0x28] sm:$0xff]  ;;  %s4118_s16 = sld [smem:[#allocation24_spill]]  ;;  %v551_v18 = vlaneseq  ;;  %p2219_p1 = scmp.ne.s32.totalorder %s2962_s11, 4 }
  0x96   : > { %699 = vmatpush.bf16.xpose.msra.mxu0 %v2338_v2  ;;  %2364 = vmatpush.bf16.xpose.msra.mxu2 %v2338_v2  ;;  %v2335_v5 = vld [vmem:[%s3258_s8 + $0x20] sm:$0xff]  ;;  %v2334_v6 = vld [vmem:[%s3258_s8 + $0x18] sm:$0xff]  ;;  %v2333_v7 = vld [vmem:[%s3258_s8 + $0x10] sm:$0xff]  ;;  %s4166_s5 = sld [smem:[#allocation48_spill]] (!%p2219_p1) }
  0x97   : > { %1253 = vmatpush.bf16.msra.mxu1 %v2338_v2  ;;  %2372 = vmatpush.bf16.msra.mxu3 %v2338_v2  ;;  %v2332_v8 = vld [vmem:[%s3258_s8 + $0x8] sm:$0xff]  ;;  %v2331_v9 = vld [vmem:[%s3258_s8] sm:$0xff]  ;;  %v3320_v11 = vld [vmem:[%s3251_s24 + $0x18] sm:$0xff]  ;;  %v3349_v19 = vshrl.u32 %v551_v18, 7  ;;  %s4167_s21 = sld [smem:[#allocation50_spill]] (!%p2219_p1) }
  0x98   : > { %v3317_v10 = vld [vmem:[%s3251_s24] sm:$0xff]  ;;  %4117 = vst [vmem:[#allocation32_spill] sm:$0xff] %v3320_v11  ;;  %v3325_v12 = vld [vmem:[%s3251_s24 + $0x8] sm:$0xff]  ;;  %v3333_v14 = vld [vmem:[%s3251_s24 + $0x10] sm:$0xff] }
  0x99   : > { %4116 = vst [vmem:[#allocation31_spill] sm:$0xff] %v3317_v10  ;;  %v3328_v13 = vld [vmem:[%s3251_s24 + $0x20] sm:$0xff]  ;;  %v3336_v15 = vld [vmem:[%s3251_s24 + $0x28] sm:$0xff]  ;;  %v3341_v16 = vld [vmem:[%s3251_s24 + $0x30] sm:$0xff]  ;;  %v558_v24 = vadd.s32 48, %v3349_v19  ;;  %v559_v29 = vadd.s32 56, %v3349_v19 }
  0x9a   : > { %4119 = vst [vmem:[#allocation33_spill] sm:$0xff] %v3325_v12  ;;  %v3345_v17 = vld [vmem:[%s3251_s24 + $0x38] sm:$0xff]  ;;  %v553_v32 = vadd.s32 8, %v3349_v19  ;;  %v554_v36 = vadd.s32 16, %v3349_v19  ;;  %v560_v38 = vadd.s32 64, %v3349_v19  ;;  %v561_v48 = vadd.s32 72, %v3349_v19 }
  0x9b   : > { %1254 = vmatpush.bf16.msra.mxu1 %v2337_v3  ;;  %2373 = vmatpush.bf16.msra.mxu3 %v2337_v3  ;;  %4120 = vst [vmem:[#allocation34_spill] sm:$0xff] %v3328_v13  ;;  %s2130_s30 = sshll.u32 %s4118_s16, 7  ;;  %v3361_v22 = vld [vmem:[%s384_s18] ss:$0 sm:$0xff]  ;;  %v555_v49 = vadd.s32 24, %v3349_v19  ;;  %v556_v53 = vadd.s32 32, %v3349_v19 }
  0x9c   : > { %4121 = vst [vmem:[#allocation35_spill] sm:$0xff] %v3333_v14  ;;  %v3353_v20 = vstv %s2130_s30  ;;  %v562_v60 = vadd.s32 80, %v3349_v19  ;;  %v557_v63 = vadd.s32 40, %v3349_v19 }
  0x9d   : > { %4122 = vst [vmem:[#allocation36_spill] sm:$0xff] %v3336_v15  ;;  %v3357_v21 = vadd.s32 %v3353_v20, %v3349_v19  ;;  %v3373_v27 = vadd.s32 %v3353_v20, %v558_v24  ;;  %v3380_v33 = vadd.s32 %v3353_v20, %v559_v29  ;;  %v3389_v35 = vadd.s32 %v3353_v20, %v553_v32 }
  0x9e   : > { %700 = vmatpush.bf16.xpose.msra.mxu0 %v2337_v3  ;;  %2365 = vmatpush.bf16.xpose.msra.mxu2 %v2337_v3  ;;  %4123 = vst [vmem:[#allocation37_spill] sm:$0xff] %v3341_v16  ;;  %v3398_v42 = vadd.s32 %v3353_v20, %v554_v36  ;;  %v3407_v44 = vadd.s32 %v3353_v20, %v560_v38  ;;  %v564_v29 = vadd.s32 96, %v3349_v19 }
  0x9f   : > { %1255 = vmatpush.bf16.msra.mxu1 %v2336_v4  ;;  %2374 = vmatpush.bf16.msra.mxu3 %v2336_v4  ;;  %4124 = vst [vmem:[#allocation38_spill] sm:$0xff] %v3345_v17  ;;  %vm587_vm1 = vcmp.eq.s32.totalorder %v3357_v21, %v3361_v22  ;;  %vm593_vm2 = vcmp.eq.s32.totalorder %v3373_v27, %v3361_v22 }
  0xa0   : > { %vm594_vm3 = vcmp.eq.s32.totalorder %v3380_v33, %v3361_v22  ;;  %vm588_vm4 = vcmp.eq.s32.totalorder %v3389_v35, %v3361_v22  ;;  %vm589_vm5 = vcmp.eq.s32.totalorder %v3398_v42, %v3361_v22  ;;  %vm595_vm6 = vcmp.eq.s32.totalorder %v3407_v44, %v3361_v22 }
  0xa1   : > { %v3435_v55 = vadd.s32 %v3353_v20, %v561_v48  ;;  %v3438_v56 = vadd.s32 %v3353_v20, %v555_v49  ;;  %v3441_v57 = vadd.s32 %v3353_v20, %v556_v53  ;;  %v3464_v3 = vadd.s32 %v3353_v20, %v562_v60 }
  0xa3   : > { %1256 = vmatpush.bf16.msra.mxu1 %v2335_v5  ;;  %2375 = vmatpush.bf16.msra.mxu3 %v2335_v5  ;;  %4125 = vst [vmem:[#allocation39_spill] sm:$0xff] %v3435_v55  ;;  %vm4065_vm7 = vcmp.eq.s32.totalorder %v3435_v55, %v3361_v22  ;;  %vm590_vm8 = vcmp.eq.s32.totalorder %v3438_v56, %v3361_v22 }
  0xa4   : > { %vm591_vm9 = vcmp.eq.s32.totalorder %v3441_v57, %v3361_v22  ;;  %vm597_vm10 = vcmp.eq.s32.totalorder %v3464_v3, %v3361_v22 }
  0xa6   : > { %701 = vmatpush.bf16.xpose.msra.mxu0 %v2336_v4  ;;  %2366 = vmatpush.bf16.xpose.msra.mxu2 %v2336_v4 }
  0xa7   : > { %1257 = vmatpush.bf16.msra.mxu1 %v2334_v6  ;;  %2376 = vmatpush.bf16.msra.mxu3 %v2334_v6 }
  0xab   : > { %1258 = vmatpush.bf16.msra.mxu1 %v2333_v7  ;;  %2377 = vmatpush.bf16.msra.mxu3 %v2333_v7 }
  0xae   : > { %702 = vmatpush.bf16.xpose.msra.mxu0 %v2335_v5  ;;  %2367 = vmatpush.bf16.xpose.msra.mxu2 %v2335_v5  ;;  %v3473_v5 = vadd.s32 %v3353_v20, %v557_v63  ;;  %v3551_v63 = vld [vmem:[#allocation2] sm:$0xff] }
  0xaf   : > { %1259 = vmatpush.bf16.msra.mxu1 %v2332_v8  ;;  %2378 = vmatpush.bf16.msra.mxu3 %v2332_v8 }
  0xb0   : > { %vm592_vm11 = vcmp.eq.s32.totalorder %v3473_v5, %v3361_v22 }
  0xb3   : > { %1260 = vmatpush.bf16.msra.mxu1 %v2331_v9  ;;  %2379 = vmatpush.bf16.msra.mxu3 %v2331_v9 }
  0xb6   : > { %703 = vmatpush.bf16.xpose.msra.mxu0 %v2334_v6  ;;  %2368 = vmatpush.bf16.xpose.msra.mxu2 %v2334_v6 }
  0xbe   : > { %704 = vmatpush.bf16.xpose.msra.mxu0 %v2333_v7  ;;  %2369 = vmatpush.bf16.xpose.msra.mxu2 %v2333_v7 }
  0xc6   : > { %705 = vmatpush.bf16.xpose.msra.mxu0 %v2332_v8  ;;  %2370 = vmatpush.bf16.xpose.msra.mxu2 %v2332_v8 }
  0xce   : > { %706 = vmatpush.bf16.xpose.msra.mxu0 %v2331_v9  ;;  %2371 = vmatpush.bf16.xpose.msra.mxu2 %v2331_v9  ;;  %v563_v9 = vadd.s32 88, %v3349_v19 }
  0xd5   : > { %707 = vmatmul.bf16.vlgmr.msra.gmra.mxu0 %v3317_v10  ;;  %722 = vmatmul.bf16.vlgmr.msra.gmra.mxu2 %v3320_v11 }
  0xe5   : > { %712 = vmatmul.bf16.gmra.mxu0 %v3325_v12  ;;  %727 = vmatmul.bf16.gmra.mxu2 %v3328_v13  ;;  %v3627_v13 = vld [vmem:[#allocation2 + $0x58] sm:$0xff] }
  0xf5   : > { %717 = vmatmul.bf16.gmra.mxu0 %v3333_v14  ;;  %732 = vmatmul.bf16.gmra.mxu2 %v3336_v15 }
 0x105   : > { %737 = vmatmul.bf16.gmra.mxu2 %v3341_v16 }
 0x115   : > { %742 = vmatmul.bf16.gmra.mxu2 %v3345_v17  ;;  %v3643_v17 = vld [vmem:[#allocation2 + $0x68] sm:$0xff] }
 0x152   : > { %v708_v23 = vpop.f32.mrf.mxu0 }
 0x153   : > { %v748_v25 = vmul.f32 0.17677669, %v708_v23 }
 0x155   : > { %v3369_v26 = vsel %vm587_vm1, %v748_v25, -1e+30  ;;  %v3493_v25 = vadd.s32 %v3353_v20, %v563_v9  ;;  %v785_v9 = vld [vmem:[#allocation2 + $0x28] sm:$0xff] }
 0x156   : > { %796 = vmax.xlane.f32.xlu0 %v3369_v26 }
 0x157   : > { %vm598_vm12 = vcmp.eq.s32.totalorder %v3493_v25, %v3361_v22 }
 0x158   : > { %v723_v28 = vpop.f32.mrf.mxu2 }
 0x159   : > { %v754_v30 = vmul.f32 0.17677669, %v723_v28 }
 0x15a   : > { %v710_v31 = vpop.f32.mrf.mxu0 }
 0x15b   : > { %v3385_v34 = vsel %vm593_vm2, %v754_v30, -1e+30  ;;  %v749_v39 = vmul.f32 0.17677669, %v710_v31  ;;  %v3499_v31 = vadd.s32 %v3353_v20, %v564_v29  ;;  %v3570_v29 = vld [vmem:[#allocation2 + $0x8] sm:$0xff] }
 0x15d   : > { %v3412_v46 = vsel %vm588_vm4, %v749_v39, -1e+30  ;;  %vm599_vm13 = vcmp.eq.s32.totalorder %v3499_v31, %v3361_v22 }
 0x15e   : > { %808 = vmax.xlane.f32.xlu0 %v3385_v34 }
 0x160   : > { %v725_v37 = vpop.f32.mrf.mxu2 }
 0x161   : > { %v755_v40 = vmul.f32 0.17677669, %v725_v37  ;;  %v565_v37 = vadd.s32 104, %v3349_v19 }
 0x162   : > { %v713_v41 = vpop.f32.mrf.mxu0 }
 0x163   : > { %v3403_v43 = vsel %vm594_vm3, %v755_v40, -1e+30  ;;  %v750_v45 = vmul.f32 0.17677669, %v713_v41  ;;  %v3517_v40 = vadd.s32 %v3353_v20, %v565_v37  ;;  %v3618_v37 = vld [vmem:[#allocation2 + $0x50] sm:$0xff] }
 0x164   : > { %810 = vmax.xlane.f32.xlu1 %v3403_v43 }
 0x165   : > { %v3424_v51 = vsel %vm589_vm5, %v750_v45, -1e+30  ;;  %vm600_vm14 = vcmp.eq.s32.totalorder %v3517_v40, %v3361_v22  ;;  %v566_v45 = vadd.s32 112, %v3349_v19 }
 0x166   : > { %798 = vmax.xlane.f32.xlu0 %v3412_v46 }
 0x167   : > { %v3529_v49 = vadd.s32 %v3353_v20, %v566_v45  ;;  %v3587_v45 = vld [vmem:[#allocation2 + $0x10] sm:$0xff] }
 0x168   : > { %v728_v47 = vpop.f32.mrf.mxu2 }
 0x169   : > { %v756_v50 = vmul.f32 0.17677669, %v728_v47  ;;  %4126 = vst [vmem:[#allocation40_spill] sm:$0xff] %v3529_v49  ;;  %vm601_vm15 = vcmp.eq.s32.totalorder %v3529_v49, %v3361_v22 }
 0x16a   : > { %v715_v52 = vpop.f32.mrf.mxu0 }
 0x16b   : > { %v3430_v54 = vsel %vm595_vm6, %v756_v50, -1e+30  ;;  %v751_v58 = vmul.f32 0.17677669, %v715_v52  ;;  %v567_v52 = vadd.s32 120, %v3349_v19 }
 0x16c   : > { %812 = vmax.xlane.f32.xlu2 %v3430_v54  ;;  %800 = vmax.xlane.f32.xlu1 %v3424_v51 }
 0x16d   : > { %v3459_v2 = vsel %vm590_vm8, %v751_v58, -1e+30 }
 0x170   : > { %v730_v59 = vpop.f32.mrf.mxu2 }
 0x171   : > { %v757_v61 = vmul.f32 0.17677669, %v730_v59  ;;  %v3541_v59 = vadd.s32 %v3353_v20, %v567_v52 }
 0x172   : > { %v718_v62 = vpop.f32.mrf.mxu0 }
 0x173   : > { %v752_v0 = vmul.f32 0.17677669, %v718_v62  ;;  %v3454_v1 = vsel %vm4065_vm7, %v757_v61, -1e+30  ;;  %4127 = vst [vmem:[#allocation41_spill] sm:$0xff] %v3541_v59  ;;  %vm602_vm0 = vcmp.eq.s32.totalorder %v3541_v59, %v3361_v22  ;;  %v2987_v62 = vmov 0  }
 0x174   : > { %814 = vmax.xlane.f32.xlu0 %v3454_v1  ;;  %802 = vmax.xlane.f32.xlu1 %v3459_v2  ;;  %vm4082_vm7 = vcmask 7168  }
 0x175   : > { %v3469_v4 = vsel %vm591_vm9, %v752_v0, -1e+30  ;;  %2555 = vset.pattern.permute.xlu1 %v2987_v62  ;;  %2556 = vset.pattern.permute.xlu2 %v2987_v62 }
 0x176   : > { %804 = vmax.xlane.f32.xlu2 %v3469_v4  ;;  %2557 = vset.pattern.permute.xlu0 %v2987_v62  ;;  %v783_v62 = vld [vmem:[#allocation2 + $0x18] sm:$0xff] }
 0x178   : > { %v733_v6 = vpop.f32.mrf.mxu2 }
 0x179   : > { %v758_v7 = vmul.f32 0.17677669, %v733_v6  ;;  %v3559_v6 = vld [vmem:[#allocation2 + $0x30] sm:$0xff] }
 0x17a   : > { %v720_v8 = vpop.f32.mrf.mxu0 }
 0x17b   : > { %v753_v18 = vmul.f32 0.17677669, %v720_v8  ;;  %v3483_v23 = vsel %vm597_vm10, %v758_v7, -1e+30 }
 0x17c   : > { %816 = vmax.xlane.f32.xlu1 %v3483_v23 }
 0x17d   : > { %v3489_v24 = vsel %vm592_vm11, %v753_v18, -1e+30  ;;  %v3568_v18 = vld [vmem:[#allocation2 + $0x38] sm:$0xff] }
 0x17e   : > { %806 = vmax.xlane.f32.xlu2 %v3489_v24 }
 0x180   : > { %v735_v28 = vpop.f32.mrf.mxu2 }
 0x181   : > { %v759_v30 = vmul.f32 0.17677669, %v735_v28 }
 0x183   : > { %v3504_v32 = vsel %vm598_vm12, %v759_v30, -1e+30 }
 0x186   : > { %818 = vmax.xlane.f32.xlu2 %v3504_v32 }
 0x188   : > { %v738_v36 = vpop.f32.mrf.mxu2 }
 0x189   : > { %v760_v38 = vmul.f32 0.17677669, %v738_v36 }
 0x18b   : > { %v3513_v39 = vsel %vm599_vm13, %v760_v38, -1e+30 }
 0x18c   : > { %820 = vmax.xlane.f32.xlu0 %v3513_v39 }
 0x190   : > { %v740_v41 = vpop.f32.mrf.mxu2 }
 0x191   : > { %v761_v47 = vmul.f32 0.17677669, %v740_v41  ;;  %v3585_v41 = vld [vmem:[#allocation2 + $0x40] sm:$0xff] }
 0x193   : > { %v3525_v48 = vsel %vm600_vm14, %v761_v47, -1e+30 }
 0x194   : > { %822 = vmax.xlane.f32.xlu1 %v3525_v48 }
 0x198   : > { %v743_v50 = vpop.f32.mrf.mxu2 }
 0x199   : > { %v762_v53 = vmul.f32 0.17677669, %v743_v50 }
 0x19b   : > { %v3537_v58 = vsel %vm601_vm15, %v762_v53, -1e+30 }
 0x19c   : > { %824 = vmax.xlane.f32.xlu2 %v3537_v58 }
 0x1a0   : > { %v745_v60 = vpop.f32.mrf.mxu2 }
 0x1a1   : > { %v763_v61 = vmul.f32 0.17677669, %v745_v60 }
 0x1a3   : > { %v3548_v19 = vsel %vm602_vm0, %v763_v61, -1e+30  ;;  %v3602_v61 = vld [vmem:[#allocation2 + $0x48] sm:$0xff] }
 0x1a4   : > { %826 = vmax.xlane.f32.xlu0 %v3548_v19 }
 0x1c9   : > { %v797_v20 = vpop.xlane.xlu0 %796 }
 0x1ca   : > { %v3554_v0 = vmax.f32 %v3551_v63, %v797_v20 }
 0x1cc   : > { %1334 = vst.msk [vmem:[#allocation2] sm:$0xff] %vm4082_vm7, %v3554_v0  ;;  %894 = vperm.xlu1 %2555, %v3554_v0  }
 0x1d1   : > { %v809_v7 = vpop.xlane.xlu0 %808 }
 0x1d2   : > { %v3562_v8 = vmax.f32 %v3559_v6, %v809_v7 }
 0x1d4   : > { %1340 = vst.msk [vmem:[#allocation2 + $0x30] sm:$0xff] %vm4082_vm7, %v3562_v8  ;;  %v4130_v59 = vsub.f32 %v3559_v6, %v3562_v8 }
 0x1d7   : > { %v811_v28 = vpop.xlane.xlu1 %810 }
 0x1d8   : > { %v3573_v30 = vmax.f32 %v3568_v18, %v811_v28  ;;  %v3604_v28 = vld [vmem:[#allocation2 + $0x20] sm:$0xff] }
 0x1d9   : > { %v799_v36 = vpop.xlane.xlu0 %798 }
 0x1da   : > { %1341 = vst.msk [vmem:[#allocation2 + $0x38] sm:$0xff] %vm4082_vm7, %v3573_v30  ;;  %v3580_v38 = vmax.f32 %v3570_v29, %v799_v36 }
 0x1dc   : > { %1335 = vst.msk [vmem:[#allocation2 + $0x8] sm:$0xff] %vm4082_vm7, %v3580_v38  ;;  %899 = vperm.xlu2 %2556, %v3580_v38  }
 0x1df   : > { %v813_v47 = vpop.xlane.xlu2 %812  ;;  %v801_v50 = vpop.xlane.xlu1 %800 }
 0x1e0   : > { %v3590_v52 = vmax.f32 %v3585_v41, %v813_v47  ;;  %v3593_v53 = vmax.f32 %v3587_v45, %v801_v50 }
 0x1e2   : > { %1342 = vst.msk [vmem:[#allocation2 + $0x40] sm:$0xff] %vm4082_vm7, %v3590_v52  ;;  %904 = vperm.xlu0 %2557, %v3593_v53  }
 0x1e3   : > { %1336 = vst.msk [vmem:[#allocation2 + $0x10] sm:$0xff] %vm4082_vm7, %v3593_v53 }
 0x1e7   : > { %v815_v20 = vpop.xlane.xlu0 %814  ;;  %v803_v7 = vpop.xlane.xlu1 %802 }
 0x1e8   : > { %v3607_v36 = vmax.f32 %v3602_v61, %v815_v20  ;;  %v831_v47 = vmax.f32 %v783_v62, %v803_v7 }
 0x1e9   : > { %v805_v50 = vpop.xlane.xlu2 %804 }
 0x1ea   : > { %1343 = vst.msk [vmem:[#allocation2 + $0x48] sm:$0xff] %vm4082_vm7, %v3607_v36  ;;  %v3612_v60 = vmax.f32 %v3604_v28, %v805_v50  ;;  %909 = vperm.xlu2 %2556, %v831_v47  }
 0x1eb   : > { %1337 = vst.msk [vmem:[#allocation2 + $0x18] sm:$0xff] %vm4082_vm7, %v831_v47 }
 0x1ec   : > { %1338 = vst.msk [vmem:[#allocation2 + $0x20] sm:$0xff] %vm4082_vm7, %v3612_v60  ;;  %914 = vperm.xlu1 %2555, %v3612_v60  }
 0x1ef   : > { %v817_v20 = vpop.xlane.xlu1 %816 }
 0x1f0   : > { %v3621_v7 = vmax.f32 %v3618_v37, %v817_v20  ;;  %v3636_v20 = vld [vmem:[#allocation2 + $0x60] sm:$0xff] }
 0x1f1   : > { %v807_v15 = vpop.xlane.xlu2 %806 }
 0x1f2   : > { %1344 = vst.msk [vmem:[#allocation2 + $0x50] sm:$0xff] %vm4082_vm7, %v3621_v7  ;;  %v833_v50 = vmax.f32 %v785_v9, %v807_v15 }
 0x1f4   : > { %1339 = vst.msk [vmem:[#allocation2 + $0x28] sm:$0xff] %vm4082_vm7, %v833_v50  ;;  %944 = vperm.xlu1 %2555, %v3621_v7   ;;  %919 = vperm.xlu2 %2556, %v833_v50  }
 0x1f9   : > { %v819_v11 = vpop.xlane.xlu2 %818 }
 0x1fa   : > { %v3630_v14 = vmax.f32 %v3627_v13, %v819_v11  ;;  %v844_v11 = vsub.f32 %v3551_v63, %v3554_v0  ;;  %v3654_v63 = vld [vmem:[#allocation2 + $0x70] sm:$0xff] }
 0x1fb   : > { %4128 = vst [vmem:[#allocation42_spill] sm:$0xff] %v3654_v63 }
 0x1fc   : > { %1345 = vst.msk [vmem:[#allocation2 + $0x58] sm:$0xff] %vm4082_vm7, %v3630_v14  ;;  %924 = vperm.xlu1 %2555, %v3562_v8   ;;  %949 = vperm.xlu2 %2556, %v3630_v14   ;;  %v860_v55 = vmul.f32 1.442695, %v844_v11  ;;  %v845_v11 = vsub.f32 %v3570_v29, %v3580_v38 }
 0x1fe   : > { %2559 = vpow2.f32 %v860_v55 }
 0x1ff   : > { %v821_v15 = vpop.xlane.xlu0 %820 }
 0x200   : > { %v840_v12 = vmax.f32 %v3636_v20, %v821_v15  ;;  %v847_v15 = vsub.f32 %v783_v62, %v831_v47  ;;  %v846_v62 = vsub.f32 %v3587_v45, %v3593_v53  ;;  %v3671_v47 = vld [vmem:[#allocation2 + $0x78] sm:$0xff] }
 0x202   : > { %1346 = vst.msk [vmem:[#allocation2 + $0x60] sm:$0xff] %vm4082_vm7, %v840_v12  ;;  %954 = vperm.xlu0 %2557, %v840_v12   ;;  %v864_v29 = vmul.f32 1.442695, %v846_v62 }
 0x204   : > { %929 = vperm.xlu1 %2555, %v3573_v30   ;;  %v3666_v55 = vpop.eup %2559 }
 0x207   : > { %v823_v10 = vpop.xlane.xlu1 %822 }
 0x208   : > { %v3646_v16 = vmax.f32 %v3643_v17, %v823_v10  ;;  %v866_v10 = vmul.f32 1.442695, %v847_v15  ;;  %v862_v15 = vmul.f32 1.442695, %v845_v11 }
 0x20a   : > { %1347 = vst.msk [vmem:[#allocation2 + $0x68] sm:$0xff] %vm4082_vm7, %v3646_v16  ;;  %959 = vperm.xlu2 %2556, %v3646_v16   ;;  %2561 = vpow2.f32 %v866_v10  ;;  %v849_v10 = vsub.f32 %v785_v9, %v833_v50  ;;  %v4131_v9 = vsub.f32 %v3568_v18, %v3573_v30  ;;  %v855_v18 = vsub.f32 %v3627_v13, %v3630_v14 }
 0x20b   : > { %2563 = vpow2.f32 %v862_v15  ;;  %v4138_v25 = vsub.f32 %v3643_v17, %v3646_v16 }
 0x20c   : > { %934 = vperm.xlu1 %2555, %v3590_v52   ;;  %2565 = vpow2.f32 %v864_v29  ;;  %v870_v8 = vmul.f32 1.442695, %v849_v10 }
 0x20f   : > { %v825_v0 = vpop.xlane.xlu2 %824 }
 0x210   : > { %v3657_v49 = vmax.f32 %v3654_v63, %v825_v0  ;;  %v848_v63 = vsub.f32 %v3604_v28, %v3612_v60  ;;  %v3687_v53 = vpop.eup %2561 }
 0x211   : > { %v3692_v60 = vpop.eup %2563 }
 0x212   : > { %4129 = vst [vmem:[#allocation43_spill] sm:$0xff] %v3657_v49  ;;  %964 = vperm.xlu0 %2557, %v3657_v49   ;;  %v868_v6 = vmul.f32 1.442695, %v848_v63  ;;  %v3694_v28 = vpop.eup %2565 }
 0x213   : > { %1348 = vst.msk [vmem:[#allocation2 + $0x70] sm:$0xff] %vm4082_vm7, %v3657_v49  ;;  %v872_v49 = vmul.f32 1.442695, %v4130_v59  ;;  %v853_v59 = vsub.f32 %v3602_v61, %v3607_v36  ;;  %v874_v61 = vmul.f32 1.442695, %v4131_v9 }
 0x214   : > { %1151 = vperm.xlu1 %2555, %v3666_v55  }
 0x215   : > { %2567 = vpow2.f32 %v872_v49  ;;  %v878_v11 = vmul.f32 1.442695, %v853_v59  ;;  %v856_v49 = vsub.f32 %v3636_v20, %v840_v12 }
 0x216   : > { %2569 = vpow2.f32 %v868_v6 }
 0x217   : > { %v827_v38 = vpop.xlane.xlu0 %826  ;;  %2571 = vpow2.f32 %v870_v8  ;;  %v884_v29 = vmul.f32 1.442695, %v856_v49 }
 0x218   : > { %v3674_v0 = vmax.f32 %v3671_v47, %v827_v38  ;;  %2573 = vpow2.f32 %v878_v11  ;;  %v854_v38 = vsub.f32 %v3618_v37, %v3621_v7 }
 0x219   : > { %2575 = vpow2.f32 %v874_v61 }
 0x21a   : > { %v859_v45 = vsub.f32 %v3671_v47, %v3674_v0  ;;  %1349 = vst.msk [vmem:[#allocation2 + $0x78] sm:$0xff] %vm4082_vm7, %v3674_v0  ;;  %969 = vperm.xlu2 %2556, %v3674_v0   ;;  %939 = vperm.xlu0 %2557, %v3607_v36   ;;  %v4132_v36 = vsub.f32 %v3585_v41, %v3590_v52  ;;  %v880_v30 = vmul.f32 1.442695, %v854_v38  ;;  %v882_v41 = vmul.f32 1.442695, %v855_v18  ;;  %vm2195_vm7 = vmpackc.low %vm588_vm4, %vm587_vm1  ;;  %v4139_v47 = vld [vmem:[#allocation42_spill] sm:$0xff] }
 0x21b   : > { %v3698_v62 = vpop.eup %2567  ;;  %v4140_v0 = vld [vmem:[#allocation43_spill] sm:$0xff] }
 0x21c   : > { %1166 = vperm.xlu1 %2555, %v3687_v53   ;;  %v876_v50 = vmul.f32 1.442695, %v4132_v36  ;;  %v3708_v63 = vpop.eup %2569  ;;  %v890_v40 = vmul.f32 1.442695, %v859_v45  ;;  %v4141_v45 = vsub.f32 %v4139_v47, %v4140_v0 }
 0x21d   : > { %v3710_v15 = vpop.eup %2571 }
 0x21e   : > { %v3716_v12 = vpop.eup %2573  ;;  %2577 = vpow2.f32 %v876_v50 }
 0x21f   : > { %2579 = vpow2.f32 %v884_v29  ;;  %v3721_v52 = vpop.eup %2575 }
 0x220   : > { %2581 = vpow2.f32 %v880_v30 }
 0x221   : > { %2583 = vpow2.f32 %v882_v41 }
 0x222   : > { %1156 = vperm.xlu2 %2556, %v3692_v60   ;;  %1161 = vperm.xlu0 %2557, %v3694_v28  }
 0x224   : > { %1181 = vperm.xlu1 %2555, %v3698_v62   ;;  %v3723_v20 = vpop.eup %2577 }
 0x225   : > { %v3727_v37 = vpop.eup %2579 }
 0x226   : > { %v3730_v14 = vpop.eup %2581 }
 0x227   : > { %v3732_v7 = vpop.eup %2583 }
 0x22a   : > { %1176 = vperm.xlu2 %2556, %v3710_v15   ;;  %1171 = vperm.xlu0 %2557, %v3708_v63  }
 0x22c   : > { %1196 = vperm.xlu1 %2555, %v3716_v12  }
 0x232   : > { %1191 = vperm.xlu2 %2556, %v3723_v20   ;;  %1186 = vperm.xlu0 %2557, %v3721_v52  }
 0x234   : > { %1211 = vperm.xlu1 %2555, %v3727_v37  }
 0x236   : > { %v900_v13 = vpop.permute.xlu2 %899 }
 0x237   : > { %v973_v10 = vsub.f32 %v3412_v46, %v900_v13 }
 0x239   : > { %v990_v59 = vmul.f32 1.442695, %v973_v10 }
 0x23a   : > { %1206 = vperm.xlu2 %2556, %v3732_v7   ;;  %1201 = vperm.xlu0 %2557, %v3730_v14  }
 0x23b   : > { %2585 = vpow2.f32 %v990_v59 }
 0x23e   : > { %v895_v6 = vpop.permute.xlu1 %894 }
 0x23f   : > { %v972_v8 = vsub.f32 %v3369_v26, %v895_v6 }
 0x241   : > { %v988_v11 = vmul.f32 1.442695, %v972_v8  ;;  %v2586_v49 = vpop.eup %2585 }
 0x242   : > { %v1021_v30 = vsel %vm588_vm4, %v2586_v49, 0.0  ;;  %vm2210_vm4 = vmpackc.low %vm598_vm12, %vm597_vm10 }
 0x243   : > { %2587 = vpow2.f32 %v988_v11 }
 0x244   : > { %v910_v61 = vpop.permute.xlu2 %909 }
 0x245   : > { %v975_v36 = vsub.f32 %v3459_v2, %v910_v61 }
 0x247   : > { %v994_v50 = vmul.f32 1.442695, %v975_v36 }
 0x249   : > { %v2588_v9 = vpop.eup %2587  ;;  %2589 = vpow2.f32 %v994_v50 }
 0x24a   : > { %v2196_v46 = vpack.c.bf16 %v2586_v49, %v2588_v9  ;;  %v1020_v8 = vsel %vm587_vm1, %v2588_v9, 0.0  ;;  %vm2201_vm1 = vmpackc.low %vm592_vm11, %vm591_vm9 }
 0x24c   : > { %2197 = vmatmul.msk.bf16.vlgmr.msra.gmra.mxu1 %vm2195_vm7, %v2196_v46  ;;  %vm2198_vm7 = vmpackc.low %vm590_vm8, %vm589_vm5 }
 0x24e   : > { %v920_v26 = vpop.permute.xlu2 %919 }
 0x24f   : > { %v3749_v41 = vpop.eup %2589  ;;  %v977_v35 = vsub.f32 %v3489_v24, %v920_v26 }
 0x254   : > { %v905_v29 = vpop.permute.xlu0 %904 }
 0x255   : > { %v974_v38 = vsub.f32 %v3424_v51, %v905_v29 }
 0x256   : > { %v950_v59 = vpop.permute.xlu2 %949 }
 0x257   : > { %v992_v18 = vmul.f32 1.442695, %v974_v38  ;;  %v983_v6 = vsub.f32 %v3504_v32, %v950_v59 }
 0x259   : > { %2591 = vpow2.f32 %v992_v18  ;;  %v1010_v49 = vmul.f32 1.442695, %v983_v6 }
 0x25e   : > { %v915_v13 = vpop.permute.xlu1 %914  ;;  %1070 = vadd.xlane.f32.xlu1 %v1021_v30 }
 0x25f   : > { %v2592_v10 = vpop.eup %2591  ;;  %v976_v2 = vsub.f32 %v3469_v4, %v915_v13  ;;  %v998_v4 = vmul.f32 1.442695, %v977_v35 }
 0x260   : > { %v2199_v51 = vpack.c.bf16 %v3749_v41, %v2592_v10 }
 0x261   : > { %v996_v11 = vmul.f32 1.442695, %v976_v2 }
 0x262   : > { %2200 = vmatmul.msk.bf16.gmra.mxu1 %vm2198_vm7, %v2199_v51  ;;  %vm2204_vm7 = vmpackc.low %vm594_vm3, %vm593_vm2 }
 0x263   : > { %1068 = vadd.xlane.f32.xlu2 %v1020_v8  ;;  %2593 = vpow2.f32 %v996_v11 }
 0x264   : > { %2595 = vpow2.f32 %v998_v4  ;;  %v960_v29 = vpop.permute.xlu2 %959 }
 0x265   : > { %2597 = vpow2.f32 %v1010_v49 }
 0x266   : > { %v945_v46 = vpop.permute.xlu1 %944 }
 0x267   : > { %v982_v61 = vsub.f32 %v3483_v23, %v945_v46 }
 0x269   : > { %v1008_v36 = vmul.f32 1.442695, %v982_v61  ;;  %v2594_v24 = vpop.eup %2593 }
 0x26a   : > { %v3765_v32 = vpop.eup %2595 }
 0x26b   : > { %2599 = vpow2.f32 %v1008_v36  ;;  %v3774_v9 = vpop.eup %2597  ;;  %v2202_v23 = vpack.c.bf16 %v3765_v32, %v2594_v24  ;;  %v1025_v56 = vsel %vm592_vm11, %v3765_v32, 0.0 }
 0x26e   : > { %v925_v50 = vpop.permute.xlu1 %924 }
 0x26f   : > { %v978_v21 = vsub.f32 %v3385_v34, %v925_v50  ;;  %v985_v34 = vsub.f32 %v3525_v48, %v960_v29 }
 0x271   : > { %v2600_v26 = vpop.eup %2599  ;;  %v1000_v38 = vmul.f32 1.442695, %v978_v21  ;;  %v1014_v59 = vmul.f32 1.442695, %v985_v34 }
 0x272   : > { %2203 = vmatmul.msk.bf16.gmra.mxu1 %vm2201_vm1, %v2202_v23  ;;  %v2211_v18 = vpack.c.bf16 %v3774_v9, %v2600_v26  ;;  %vm2213_vm1 = vmpackc.low %vm600_vm14, %vm599_vm13  ;;  %v1030_v57 = vsel %vm597_vm10, %v2600_v26, 0.0 }
 0x273   : > { %2601 = vpow2.f32 %v1000_v38 }
 0x274   : > { %v955_v30 = vpop.permute.xlu0 %954  ;;  %2212 = vmatmul.msk.bf16.vlgmr.msra.gmra.mxu3 %vm2210_vm4, %v2211_v18  ;;  %v970_v46 = vpop.permute.xlu2 %969 }
 0x275   : > { %v984_v13 = vsub.f32 %v3513_v39, %v955_v30  ;;  %v987_v29 = vsub.f32 %v3548_v19, %v970_v46  ;;  %v1024_v19 = vsel %vm591_vm9, %v2594_v24, 0.0 }
 0x276   : > { %v930_v2 = vpop.permute.xlu1 %929 }
 0x277   : > { %v1012_v51 = vmul.f32 1.442695, %v984_v13  ;;  %v979_v35 = vsub.f32 %v3403_v43, %v930_v2  ;;  %v1018_v38 = vmul.f32 1.442695, %v987_v29  ;;  %v1134_v29 = vld [vmem:[#allocation4] sm:$0xff]  ;;  %v1135_v2 = vld [vmem:[#allocation4 + $0x58] sm:$0xff] }
 0x279   : > { %v2602_v6 = vpop.eup %2601  ;;  %2603 = vpow2.f32 %v1012_v51  ;;  %v1002_v8 = vmul.f32 1.442695, %v979_v35  ;;  %v4135_v35 = vld [vmem:[#allocation39_spill] sm:$0xff] }
 0x27a   : > { %2605 = vpow2.f32 %v1014_v59  ;;  %v1026_v48 = vsel %vm593_vm2, %v2602_v6, 0.0  ;;  %vm2216_vm2 = vmpackc.low %vm602_vm0, %vm601_vm15 }
 0x27b   : > { %2607 = vpow2.f32 %v1002_v8  ;;  %1080 = vadd.xlane.f32.xlu0 %v1026_v48  ;;  %v1031_v8 = vsel %vm598_vm12, %v3774_v9, 0.0  ;;  %v886_v9 = vmul.f32 1.442695, %v4138_v25  ;;  %v1043_v25 = vld [vmem:[#allocation3 + $0x38] sm:$0xff] }
 0x27c   : > { %v1157_v48 = vpop.permute.xlu2 %1156  ;;  %v1059_v0 = vmul.f32 %v3721_v52, %v1043_v25 }
 0x27e   : > { %v935_v11 = vpop.permute.xlu1 %934 }
 0x27f   : > { %v2604_v4 = vpop.eup %2603  ;;  %v980_v49 = vsub.f32 %v3430_v54, %v935_v11  ;;  %v1022_v54 = vsel %vm589_vm5, %v2592_v10, 0.0 }
 0x280   : > { %v2606_v39 = vpop.eup %2605 }
 0x281   : > { %v2608_v43 = vpop.eup %2607  ;;  %v1004_v61 = vmul.f32 1.442695, %v980_v49  ;;  %v2214_v50 = vpack.c.bf16 %v2606_v39, %v2604_v4  ;;  %v1033_v44 = vsel %vm600_vm14, %v2606_v39, 0.0 }
 0x282   : > { %v1027_v27 = vsel %vm594_vm3, %v2608_v43, 0.0  ;;  %v2205_v36 = vpack.c.bf16 %v2608_v43, %v2602_v6  ;;  %vm4136_vm3 = vcmp.eq.s32.totalorder %v4135_v35, %v3361_v22  ;;  %v888_v22 = vmul.f32 1.442695, %v4141_v45  ;;  %v1133_v43 = vld [vmem:[#allocation4 + $0x30] sm:$0xff] }
 0x283   : > { %2609 = vpow2.f32 %v1004_v61  ;;  %1072 = vadd.xlane.f32.xlu0 %v1022_v54  ;;  %1082 = vadd.xlane.f32.xlu1 %v1027_v27  ;;  %vm2207_vm5 = vmpackc.low %vm4136_vm3, %vm595_vm6 }
 0x284   : > { %v965_v21 = vpop.permute.xlu0 %964  ;;  %2206 = vmatmul.msk.bf16.gmra.mxu1 %vm2204_vm7, %v2205_v36  ;;  %2215 = vmatmul.msk.bf16.gmra.mxu3 %vm2213_vm1, %v2214_v50  ;;  %vm4137_vm9 = vmmov %vm4136_vm3  ;;  %v1177_v49 = vpop.permute.xlu2 %1176 }
 0x285   : > { %v986_v23 = vsub.f32 %v3537_v58, %v965_v21  ;;  %v1037_v21 = vld [vmem:[#allocation3 + $0x8] sm:$0xff] }
 0x286   : > { %v1152_v6 = vpop.permute.xlu1 %1151 }
 0x287   : > { %v1016_v34 = vmul.f32 1.442695, %v986_v23  ;;  %v1229_v61 = vmul.f32 %v1152_v6, %v1133_v43 }
 0x289   : > { %v2610_v42 = vpop.eup %2609  ;;  %2611 = vpow2.f32 %v1016_v34  ;;  %v1053_v34 = vmul.f32 %v3692_v60, %v1037_v21 }
 0x28a   : > { %v1028_v33 = vsel %vm595_vm6, %v2610_v42, 0.0  ;;  %2613 = vpow2.f32 %v1018_v38  ;;  %v1230_v38 = vmul.f32 %v1157_v48, %v1134_v29  ;;  %vm4142_vm6 = vcmask 7168   ;;  %v1038_v48 = vld [vmem:[#allocation3 + $0x10] sm:$0xff] }
 0x28b   : > { %1084 = vadd.xlane.f32.xlu2 %v1028_v33  ;;  %1076 = vadd.xlane.f32.xlu1 %v1024_v19  ;;  %vm4144_vm10 = vmmov %vm4142_vm6  ;;  %v1054_v47 = vmul.f32 %v3694_v28, %v1038_v48  ;;  %v1139_v28 = vld [vmem:[#allocation4 + $0x8] sm:$0xff] }
 0x28c   : > { %v940_v10 = vpop.permute.xlu0 %939  ;;  %v3882_v17 = vpop.permute.xlu2 %1191  ;;  %vm4145_vm11 = vmmov %vm4142_vm6 }
 0x28d   : > { %v981_v18 = vsub.f32 %v3454_v1, %v940_v10  ;;  %v1023_v1 = vsel %vm590_vm8, %v3749_v41, 0.0  ;;  %v1032_v41 = vsel %vm599_vm13, %v2604_v4, 0.0  ;;  %vm4143_vm8 = vmmov %vm4142_vm6 }
 0x28e   : > { %v1167_v32 = vpop.permute.xlu1 %1166  ;;  %vm4146_vm12 = vmmov %vm4142_vm6 }
 0x28f   : > { %v2612_v30 = vpop.eup %2611  ;;  %v1006_v58 = vmul.f32 1.442695, %v981_v18  ;;  %vm4147_vm13 = vmmov %vm4142_vm6 }
 0x290   : > { %v2614_v13 = vpop.eup %2613  ;;  %v1034_v31 = vsel %vm601_vm15, %v2612_v30, 0.0  ;;  %vm4148_vm14 = vmmov %vm4142_vm6 }
 0x291   : > { %2615 = vpow2.f32 %v1006_v58  ;;  %v2217_v24 = vpack.c.bf16 %v2614_v13, %v2612_v30  ;;  %v1035_v5 = vsel %vm602_vm0, %v2614_v13, 0.0  ;;  %v1036_v30 = vld [vmem:[#allocation3] sm:$0xff]  ;;  %vm4149_vm15 = vmmov %vm4142_vm6 }
 0x292   : > { %2617 = vpow2.f32 %v890_v40  ;;  %v1052_v58 = vmul.f32 %v3666_v55, %v1036_v30  ;;  %vm4150_vm0 = vmmov %vm4142_vm6 }
 0x293   : > { %1088 = vadd.xlane.f32.xlu1 %v1030_v57  ;;  %1074 = vadd.xlane.f32.xlu2 %v1023_v1  ;;  %2619 = vpow2.f32 %v886_v9  ;;  %v1138_v9 = vld [vmem:[#allocation4 + $0x68] sm:$0xff]  ;;  %vm4151_vm4 = vmmov %vm4150_vm0 }
 0x294   : > { %2218 = vmatmul.msk.bf16.gmra.mxu3 %vm2216_vm2, %v2217_v24  ;;  %2621 = vpow2.f32 %v888_v22  ;;  %v1162_v54 = vpop.permute.xlu0 %1161  ;;  %v3886_v23 = vpop.permute.xlu2 %1206  ;;  %v1234_v45 = vmul.f32 %v1177_v49, %v1138_v9  ;;  %vm4152_vm7 = vmmov %vm4150_vm0 }
 0x295   : > { %v1231_v1 = vmul.f32 %v1162_v54, %v1135_v2  ;;  %vm4153_vm1 = vmmov %vm4150_vm0 }
 0x296   : > { %v3869_v4 = vpop.permute.xlu1 %1181  ;;  %vm4154_vm2 = vmmov %vm4150_vm0 }
 0x297   : > { %v2616_v51 = vpop.eup %2615  ;;  %vm4155_vm3 = vmmov %vm4150_vm0 }
 0x298   : > { %v1029_v3 = vsel %vm4137_vm9, %v2616_v51, 0.0  ;;  %v2208_v26 = vpack.c.bf16 %v2616_v51, %v2610_v42  ;;  %v3866_v11 = vpop.eup %2617  ;;  %v1136_v51 = vld [vmem:[#allocation4 + $0x18] sm:$0xff]  ;;  %vm4157_vm9 = vmmov %vm4150_vm0 }
 0x299   : > { %1086 = vadd.xlane.f32.xlu0 %v1029_v3  ;;  %v3874_v39 = vpop.eup %2619  ;;  %v1232_v35 = vmul.f32 %v1167_v32, %v1136_v51  ;;  %v1143_v32 = vld [vmem:[#allocation4 + $0x10] sm:$0xff] }
 0x29a   : > { %2209 = vmatmul.msk.bf16.gmra.mxu1 %vm2207_vm5, %v2208_v26  ;;  %v3879_v16 = vpop.eup %2621  ;;  %vm4156_vm5 = vmmov %vm4150_vm0 }
 0x29b   : > { %1078 = vadd.xlane.f32.xlu2 %v1025_v56  ;;  %1094 = vadd.xlane.f32.xlu1 %v1033_v44  ;;  %v1042_v44 = vld [vmem:[#allocation3 + $0x30] sm:$0xff] }
 0x29c   : > { %v1172_v19 = vpop.permute.xlu0 %1171  ;;  %v1058_v55 = vmul.f32 %v3698_v62, %v1042_v44 }
 0x29e   : > { %v3877_v46 = vpop.permute.xlu1 %1196 }
 0x2a1   : > { %1092 = vadd.xlane.f32.xlu0 %v1032_v41  ;;  %v1137_v41 = vld [vmem:[#allocation4 + $0x50] sm:$0xff] }
 0x2a2   : > { %v1233_v6 = vmul.f32 %v1172_v19, %v1137_v41 }
 0x2a3   : > { %1090 = vadd.xlane.f32.xlu2 %v1031_v8 }
 0x2a4   : > { %v3892_v57 = vpop.permute.xlu0 %1186 }
 0x2a6   : > { %v3884_v27 = vpop.permute.xlu1 %1211 }
 0x2a9   : > { %1098 = vadd.xlane.f32.xlu0 %v1035_v5 }
 0x2ab   : > { %1096 = vadd.xlane.f32.xlu2 %v1034_v31 }
 0x2ac   : > { %v1202_v3 = vpop.permute.xlu0 %1201 }
 0x2ad   : > { %v1239_v22 = vmul.f32 %v1202_v3, %v1143_v32 }
 0x2b4   : > { %1226 = vperm.xlu1 %2555, %v3866_v11  }
 0x2bd   : > { %1216 = vperm.xlu0 %2557, %v3874_v39  }
 0x2c3   : > { %1221 = vperm.xlu2 %2556, %v3879_v16  }
 0x2c9   : > { %v1262_v36 = vpop.f32.mrf.mxu1 }
 0x2ca   : > { %v1302_v50 = vadd.f32 %v1262_v36, %v1229_v61 }
 0x2cc   : > { %1318 = vst [vmem:[#allocation4 + $0x30] sm:$0xff] %v1302_v50 }
 0x2d1   : > { %v1264_v42 = vpop.f32.mrf.mxu1  ;;  %v1071_v33 = vpop.xlane.xlu1 %1070 }
 0x2d2   : > { %v1303_v10 = vadd.f32 %v1264_v42, %v1230_v38  ;;  %v1101_v18 = vadd.f32 %v1071_v33, %v1053_v34  ;;  %v1040_v38 = vld [vmem:[#allocation3 + $0x20] sm:$0xff]  ;;  %v1144_v42 = vld [vmem:[#allocation4 + $0x38] sm:$0xff] }
 0x2d3   : > { %v1044_v34 = vld [vmem:[#allocation3 + $0x40] sm:$0xff]  ;;  %v1056_v52 = vmul.f32 %v3708_v63, %v1040_v38  ;;  %v1240_v33 = vmul.f32 %v3886_v23, %v1144_v42  ;;  %v1039_v63 = vld [vmem:[#allocation3 + $0x18] sm:$0xff]  ;;  %v1050_v38 = vld [vmem:[#allocation3 + $0x70] sm:$0xff] }
 0x2d4   : > { %1319 = vst [vmem:[#allocation4] sm:$0xff] %v1303_v10  ;;  %v1060_v49 = vmul.f32 %v3723_v20, %v1044_v34  ;;  %v1140_v20 = vld [vmem:[#allocation4 + $0x48] sm:$0xff]  ;;  %v1055_v51 = vmul.f32 %v3687_v53, %v1039_v63  ;;  %v1142_v34 = vld [vmem:[#allocation4 + $0x20] sm:$0xff] }
 0x2d5   : > { %1118 = vst.msk [vmem:[#allocation3 + $0x8] sm:$0xff] %vm4142_vm6, %v1101_v18  ;;  %v1236_v41 = vmul.f32 %v3892_v57, %v1140_v20 }
 0x2d6   : > { %v1069_v13 = vpop.xlane.xlu2 %1068 }
 0x2d7   : > { %v1100_v59 = vadd.f32 %v1069_v13, %v1052_v58  ;;  %v1235_v13 = vmul.f32 %v3869_v4, %v1139_v28 }
 0x2d9   : > { %1117 = vst.msk [vmem:[#allocation3] sm:$0xff] %vm4143_vm8, %v1100_v59 }
 0x2df   : > { %v1267_v60 = vpop.f32.mrf.mxu1 }
 0x2e0   : > { %v1304_v24 = vadd.f32 %v1267_v60, %v1231_v1  ;;  %v1046_v60 = vld [vmem:[#allocation3 + $0x50] sm:$0xff] }
 0x2e1   : > { %v1062_v23 = vmul.f32 %v3730_v14, %v1046_v60  ;;  %v1049_v14 = vld [vmem:[#allocation3 + $0x68] sm:$0xff] }
 0x2e2   : > { %1320 = vst [vmem:[#allocation4 + $0x58] sm:$0xff] %v1304_v24  ;;  %v1145_v24 = vld [vmem:[#allocation4 + $0x60] sm:$0xff]  ;;  %v1065_v48 = vmul.f32 %v3874_v39, %v1049_v14 }
 0x2e7   : > { %v1269_v26 = vpop.f32.mrf.mxu1 }
 0x2e8   : > { %v1305_v56 = vadd.f32 %v1269_v26, %v1232_v35  ;;  %v1241_v35 = vmul.f32 %v3884_v27, %v1145_v24 }
 0x2ea   : > { %1321 = vst [vmem:[#allocation4 + $0x18] sm:$0xff] %v1305_v56 }
 0x2ee   : > { %v1081_v8 = vpop.xlane.xlu0 %1080 }
 0x2ef   : > { %v1106_v5 = vadd.f32 %v1081_v8, %v1058_v55  ;;  %v1272_v40 = vpop.f32.mrf.mxu1 }
 0x2f0   : > { %v1306_v31 = vadd.f32 %v1272_v40, %v1233_v6  ;;  %v1045_v6 = vld [vmem:[#allocation3 + $0x48] sm:$0xff] }
 0x2f1   : > { %1123 = vst.msk [vmem:[#allocation3 + $0x30] sm:$0xff] %vm4144_vm10, %v1106_v5  ;;  %v1041_v40 = vld [vmem:[#allocation3 + $0x28] sm:$0xff]  ;;  %v1061_v53 = vmul.f32 %v3716_v12, %v1045_v6  ;;  %v1141_v12 = vld [vmem:[#allocation4 + $0x40] sm:$0xff] }
 0x2f2   : > { %1322 = vst [vmem:[#allocation4 + $0x50] sm:$0xff] %v1306_v31  ;;  %v1057_v57 = vmul.f32 %v3710_v15, %v1041_v40 }
 0x2f6   : > { %v1073_v43 = vpop.xlane.xlu0 %1072  ;;  %v1083_v62 = vpop.xlane.xlu1 %1082 }
 0x2f7   : > { %v1102_v61 = vadd.f32 %v1073_v43, %v1054_v47  ;;  %v1107_v54 = vadd.f32 %v1083_v62, %v1059_v0  ;;  %v1274_v36 = vpop.f32.mrf.mxu1  ;;  %v1287_v50 = vpop.f32.mrf.mxu3  ;;  %v1048_v0 = vld [vmem:[#allocation3 + $0x60] sm:$0xff] }
 0x2f8   : > { %v1307_v29 = vadd.f32 %v1274_v36, %v1234_v45  ;;  %v1312_v21 = vadd.f32 %v1287_v50, %v1239_v22  ;;  %v1047_v45 = vld [vmem:[#allocation3 + $0x58] sm:$0xff]  ;;  %v1064_v22 = vmul.f32 %v3727_v37, %v1048_v0 }
 0x2f9   : > { %1119 = vst.msk [vmem:[#allocation3 + $0x10] sm:$0xff] %vm4145_vm11, %v1102_v61  ;;  %v1063_v15 = vmul.f32 %v3732_v7, %v1047_v45  ;;  %v1237_v61 = vmul.f32 %v3882_v17, %v1141_v12  ;;  %v1066_v7 = vmul.f32 %v3879_v16, %v1050_v38  ;;  %v1238_v17 = vmul.f32 %v3877_v46, %v1142_v34  ;;  %v1146_v46 = vld [vmem:[#allocation4 + $0x70] sm:$0xff] }
 0x2fa   : > { %1124 = vst.msk [vmem:[#allocation3 + $0x38] sm:$0xff] %vm4146_vm12, %v1107_v54 }
 0x2fb   : > { %1323 = vst [vmem:[#allocation4 + $0x68] sm:$0xff] %v1307_v29 }
 0x2fc   : > { %1328 = vst [vmem:[#allocation4 + $0x10] sm:$0xff] %v1312_v21  ;;  %v1051_v21 = vld [vmem:[#allocation3 + $0x78] sm:$0xff] }
 0x2fd   : > { %v1067_v37 = vmul.f32 %v3866_v11, %v1051_v21 }
 0x2fe   : > { %v1077_v19 = vpop.xlane.xlu1 %1076  ;;  %v1085_v10 = vpop.xlane.xlu2 %1084 }
 0x2ff   : > { %v1104_v18 = vadd.f32 %v1077_v19, %v1056_v52  ;;  %v1108_v30 = vadd.f32 %v1085_v10, %v1060_v49  ;;  %v1289_v58 = vpop.f32.mrf.mxu3 }
 0x300   : > { %v1313_v59 = vadd.f32 %v1289_v58, %v1240_v33 }
 0x301   : > { %1121 = vst.msk [vmem:[#allocation3 + $0x20] sm:$0xff] %vm4147_vm13, %v1104_v18  ;;  %v1277_v2 = vpop.f32.mrf.mxu1  ;;  %v1148_v18 = vld [vmem:[#allocation4 + $0x28] sm:$0xff] }
 0x302   : > { %1125 = vst.msk [vmem:[#allocation3 + $0x40] sm:$0xff] %vm4148_vm14, %v1108_v30  ;;  %v1308_v1 = vadd.f32 %v1277_v2, %v1235_v13  ;;  %v1147_v30 = vld [vmem:[#allocation4 + $0x78] sm:$0xff] }
 0x303   : > { %1329 = vst [vmem:[#allocation4 + $0x38] sm:$0xff] %v1313_v59 }
 0x304   : > { %1324 = vst [vmem:[#allocation4 + $0x8] sm:$0xff] %v1308_v1 }
 0x306   : > { %v1089_v4 = vpop.xlane.xlu1 %1088  ;;  %v1075_v3 = vpop.xlane.xlu2 %1074 }
 0x307   : > { %v1110_v26 = vadd.f32 %v1089_v4, %v1062_v23  ;;  %v1103_v56 = vadd.f32 %v1075_v3, %v1055_v51  ;;  %v1292_v44 = vpop.f32.mrf.mxu3 }
 0x308   : > { %v1314_v55 = vadd.f32 %v1292_v44, %v1241_v35 }
 0x309   : > { %1127 = vst.msk [vmem:[#allocation3 + $0x50] sm:$0xff] %vm4149_vm15, %v1110_v26  ;;  %v1279_v8 = vpop.f32.mrf.mxu1 }
 0x30a   : > { %1120 = vst.msk [vmem:[#allocation3 + $0x18] sm:$0xff] %vm4150_vm0, %v1103_v56  ;;  %v1309_v5 = vadd.f32 %v1279_v8, %v1236_v41 }
 0x30b   : > { %1330 = vst [vmem:[#allocation4 + $0x60] sm:$0xff] %v1314_v55 }
 0x30c   : > { %1325 = vst [vmem:[#allocation4 + $0x48] sm:$0xff] %v1309_v5  ;;  %v1087_v27 = vpop.xlane.xlu0 %1086 }
 0x30d   : > { %v1109_v31 = vadd.f32 %v1087_v27, %v1061_v53 }
 0x30e   : > { %v1095_v25 = vpop.xlane.xlu1 %1094  ;;  %v1079_v9 = vpop.xlane.xlu2 %1078 }
 0x30f   : > { %1126 = vst.msk [vmem:[#allocation3 + $0x48] sm:$0xff] %vm4151_vm4, %v1109_v31  ;;  %v1113_v32 = vadd.f32 %v1095_v25, %v1065_v48  ;;  %v1105_v47 = vadd.f32 %v1079_v9, %v1057_v57  ;;  %v1294_v43 = vpop.f32.mrf.mxu3 }
 0x311   : > { %1130 = vst.msk [vmem:[#allocation3 + $0x68] sm:$0xff] %vm4152_vm7, %v1113_v32 }
 0x312   : > { %1122 = vst.msk [vmem:[#allocation3 + $0x28] sm:$0xff] %vm4153_vm1, %v1105_v47 }
 0x314   : > { %v1093_v62 = vpop.xlane.xlu0 %1092 }
 0x315   : > { %v1112_v39 = vadd.f32 %v1093_v62, %v1064_v22 }
 0x316   : > { %v1091_v54 = vpop.xlane.xlu2 %1090 }
 0x317   : > { %1129 = vst.msk [vmem:[#allocation3 + $0x60] sm:$0xff] %vm4154_vm2, %v1112_v39  ;;  %v1111_v36 = vadd.f32 %v1091_v54, %v1063_v15  ;;  %v1282_v50 = vpop.f32.mrf.mxu1  ;;  %v1297_v52 = vpop.f32.mrf.mxu3 }
 0x318   : > { %v1310_v29 = vadd.f32 %v1282_v50, %v1237_v61 }
 0x319   : > { %1128 = vst.msk [vmem:[#allocation3 + $0x58] sm:$0xff] %vm4155_vm3, %v1111_v36 }
 0x31a   : > { %1326 = vst [vmem:[#allocation4 + $0x40] sm:$0xff] %v1310_v29 }
 0x31c   : > { %v1099_v42 = vpop.xlane.xlu0 %1098 }
 0x31d   : > { %v1115_v28 = vadd.f32 %v1099_v42, %v1067_v37 }
 0x31e   : > { %v1097_v49 = vpop.xlane.xlu2 %1096 }
 0x31f   : > { %1132 = vst.msk [vmem:[#allocation3 + $0x78] sm:$0xff] %vm4156_vm5, %v1115_v28  ;;  %v1114_v33 = vadd.f32 %v1097_v49, %v1066_v7  ;;  %v1284_v19 = vpop.f32.mrf.mxu1  ;;  %v1299_v2 = vpop.f32.mrf.mxu3 }
 0x320   : > { %v1311_v10 = vadd.f32 %v1284_v19, %v1238_v17 }
 0x321   : > { %1131 = vst.msk [vmem:[#allocation3 + $0x70] sm:$0xff] %vm4157_vm9, %v1114_v33 }
 0x322   : > { %1327 = vst [vmem:[#allocation4 + $0x20] sm:$0xff] %v1311_v10 }
 0x326   : > { %v1227_v58 = vpop.permute.xlu1 %1226  ;;  %v1222_v11 = vpop.permute.xlu2 %1221 }
 0x327   : > { %v1244_v13 = vmul.f32 %v1227_v58, %v1148_v18  ;;  %v1243_v59 = vmul.f32 %v1222_v11, %v1147_v30 }
 0x329   : > { %v1317_v16 = vadd.f32 %v1299_v2, %v1244_v13  ;;  %v1316_v1 = vadd.f32 %v1297_v52, %v1243_v59 }
 0x32b   : > { %1333 = vst [vmem:[#allocation4 + $0x28] sm:$0xff] %v1317_v16 }
 0x32c   : > { %1332 = vst [vmem:[#allocation4 + $0x78] sm:$0xff] %v1316_v1 }
 0x32f   : > { %v1217_v60 = vpop.permute.xlu0 %1216 }
 0x330   : > { %v1242_v63 = vmul.f32 %v1217_v60, %v1146_v46  ;;  %1353 = sbr.rel (%p2219_p1) target bundleno = 1323 (0x52b), region = 84 }
 0x332   : > { %v1315_v24 = vadd.f32 %v1294_v43, %v1242_v63 }
 0x334   : > { %1331 = vst [vmem:[#allocation4 + $0x70] sm:$0xff] %v1315_v24 }
 0x335   : > { %v1356_v20 = vld [vmem:[#allocation3 + $0x10] sm:$0xff]  ;;  %v1354_v23 = vld [vmem:[#allocation3] sm:$0xff]  ;;  %v2988_v51 = vmov 0   ;;  %v1357_v35 = vld [vmem:[#allocation3 + $0x18] sm:$0xff] }
 0x336   : > { %2624 = vset.pattern.permute.xlu1 %v2988_v51  ;;  %2623 = vset.pattern.permute.xlu0 %v2988_v51  ;;  %2628 = vrcp.f32 %v1356_v20  ;;  %v1355_v4 = vld [vmem:[#allocation3 + $0x8] sm:$0xff]  ;;  %v1358_v3 = vld [vmem:[#allocation3 + $0x20] sm:$0xff]  ;;  %vm1372_vm6 = vcmp.gt.f32.partialorder %v1356_v20, 0.0  ;;  %vm1370_vm8 = vcmp.gt.f32.partialorder %v1354_v23, 0.0  ;;  %v1361_v6 = vld [vmem:[#allocation3 + $0x38] sm:$0xff]  ;;  %vm1373_vm10 = vcmp.gt.f32.partialorder %v1357_v35, 0.0 }
 0x337   : > { %2630 = vrcp.f32 %v1354_v23  ;;  %2625 = vset.pattern.permute.xlu2 %v2988_v51  ;;  %v1359_v41 = vld [vmem:[#allocation3 + $0x28] sm:$0xff]  ;;  %v1360_v5 = vld [vmem:[#allocation3 + $0x30] sm:$0xff]  ;;  %vm1374_vm11 = vcmp.gt.f32.partialorder %v1358_v3, 0.0  ;;  %vm1371_vm12 = vcmp.gt.f32.partialorder %v1355_v4, 0.0  ;;  %v1366_v48 = vld [vmem:[#allocation3 + $0x60] sm:$0xff]  ;;  %vm1377_vm14 = vcmp.gt.f32.partialorder %v1361_v6, 0.0 }
 0x338   : > { %2632 = vrcp.f32 %v1357_v35  ;;  %vm1375_vm13 = vcmp.gt.f32.partialorder %v1359_v41, 0.0  ;;  %v1362_v25 = vld [vmem:[#allocation3 + $0x40] sm:$0xff]  ;;  %v1367_v47 = vld [vmem:[#allocation3 + $0x68] sm:$0xff]  ;;  %vm1376_vm15 = vcmp.gt.f32.partialorder %v1360_v5, 0.0  ;;  %v2353_v12 = vld [vmem:[#allocation13 + $0x30] sm:$0xff]  ;;  %vm1382_vm0 = vcmp.gt.f32.partialorder %v1366_v48, 0.0 }
 0x339   : > { %2634 = vrcp.f32 %v1355_v4  ;;  %v2354_v9 = vld [vmem:[#allocation13 + $0x38] sm:$0xff]  ;;  %v3932_v62 = vld [vmem:[#allocation11 + $0x30] sm:$0xff]  ;;  %v1363_v15 = vld [vmem:[#allocation3 + $0x48] sm:$0xff]  ;;  %vm1378_vm4 = vcmp.gt.f32.partialorder %v1362_v25, 0.0  ;;  %vm1383_vm7 = vcmp.gt.f32.partialorder %v1367_v47, 0.0 }
 0x33a   : > { %2636 = vrcp.f32 %v1358_v3  ;;  %2380 = vmatpush.bf16.msra.mxu3 %v2354_v9  ;;  %1618 = vmatpush.bf16.msra.mxu0 %v2354_v9  ;;  %v3929_v22 = vld [vmem:[#allocation11 + $0x38] sm:$0xff]  ;;  %v2352_v61 = vld [vmem:[#allocation13 + $0x28] sm:$0xff]  ;;  %v2351_v37 = vld [vmem:[#allocation13 + $0x20] sm:$0xff]  ;;  %vm1379_vm1 = vcmp.gt.f32.partialorder %v1363_v15, 0.0 }
 0x33b   : > { %2638 = vrcp.f32 %v1359_v41  ;;  %1715 = vmatpush.bf16.msra.mxu1 %v3929_v22  ;;  %v1369_v36 = vld [vmem:[#allocation3 + $0x78] sm:$0xff]  ;;  %v3935_v50 = vld [vmem:[#allocation11 + $0x28] sm:$0xff]  ;;  %v2343_v28 = vld [vmem:[#allocation11 + $0x20] sm:$0xff] }
 0x33c   : > { %v2629_v26 = vpop.eup %2628  ;;  %2640 = vrcp.f32 %v1361_v6  ;;  %v1368_v21 = vld [vmem:[#allocation3 + $0x70] sm:$0xff]  ;;  %v2350_v52 = vld [vmem:[#allocation13 + $0x18] sm:$0xff]  ;;  %vm1385_vm2 = vcmp.gt.f32.partialorder %v1369_v36, 0.0  ;;  %v2347_v46 = vld [vmem:[#allocation13] sm:$0xff] }
 0x33d   : > { %v2631_v56 = vpop.eup %2630  ;;  %v1404_v44 = vsel %vm1372_vm6, %v2629_v26, 0.0  ;;  %2642 = vrcp.f32 %v1360_v5  ;;  %v1364_v17 = vld [vmem:[#allocation3 + $0x50] sm:$0xff]  ;;  %v2342_v33 = vld [vmem:[#allocation11 + $0x18] sm:$0xff]  ;;  %vm1384_vm3 = vcmp.gt.f32.partialorder %v1368_v21, 0.0  ;;  %v4159_v24 = vld [vmem:[#allocation31_spill] sm:$0xff] }
 0x33e   : > { %1446 = vperm.xlu1 %2624, %v1404_v44   ;;  %v1402_v55 = vsel %vm1370_vm8, %v2631_v56, 0.0  ;;  %v2633_v8 = vpop.eup %2632  ;;  %2644 = vrcp.f32 %v1366_v48  ;;  %2381 = vmatpush.bf16.msra.mxu3 %v2353_v12  ;;  %v1365_v10 = vld [vmem:[#allocation3 + $0x58] sm:$0xff]  ;;  %v2348_v59 = vld [vmem:[#allocation13 + $0x8] sm:$0xff]  ;;  %vm1380_vm5 = vcmp.gt.f32.partialorder %v1364_v17, 0.0  ;;  %v4162_v51 = vld [vmem:[#allocation35_spill] sm:$0xff] }
 0x33f   : > { %1436 = vperm.xlu0 %2623, %v1402_v55   ;;  %v2635_v14 = vpop.eup %2634  ;;  %v1405_v53 = vsel %vm1373_vm10, %v2633_v8, 0.0  ;;  %2646 = vrcp.f32 %v1362_v25  ;;  %1619 = vmatpush.bf16.msra.mxu0 %v2353_v12  ;;  %v2349_v58 = vld [vmem:[#allocation13 + $0x10] sm:$0xff]  ;;  %vm1381_vm9 = vcmp.gt.f32.partialorder %v1365_v10, 0.0  ;;  %v4160_v20 = vld [vmem:[#allocation38_spill] sm:$0xff]  ;;  %v2340_v4 = vld [vmem:[#allocation11 + $0x8] sm:$0xff] }
 0x340   : > { %v2637_v40 = vpop.eup %2636  ;;  %v1403_v31 = vsel %vm1371_vm12, %v2635_v14, 0.0  ;;  %2648 = vrcp.f32 %v1367_v47  ;;  %1716 = vmatpush.bf16.msra.mxu1 %v3932_v62  ;;  %v4158_v63 = vld [vmem:[#allocation37_spill] sm:$0xff]  ;;  %v4163_v3 = vld [vmem:[#allocation32_spill] sm:$0xff]  ;;  %v2339_v26 = vld [vmem:[#allocation11] sm:$0xff] }
 0x341   : > { %v1406_v27 = vsel %vm1374_vm11, %v2637_v40, 0.0  ;;  %v2639_v57 = vpop.eup %2638  ;;  %2650 = vrcp.f32 %v1363_v15  ;;  %v4161_v23 = vld [vmem:[#allocation33_spill] sm:$0xff]  ;;  %v4164_v56 = vld [vmem:[#allocation34_spill] sm:$0xff]  ;;  %v4165_v14 = vld [vmem:[#allocation36_spill] sm:$0xff] }
 0x342   : > { %1456 = vperm.xlu2 %2625, %v1406_v27   ;;  %v2641_v32 = vpop.eup %2640  ;;  %v1407_v45 = vsel %vm1375_vm13, %v2639_v57, 0.0  ;;  %2382 = vmatpush.bf16.msra.mxu3 %v2352_v61  ;;  %2652 = vrcp.f32 %v1369_v36  ;;  %v2341_v35 = vld [vmem:[#allocation11 + $0x10] sm:$0xff]  ;;  %v1419_v8 = vld [vmem:[#allocation4] sm:$0xff] }
 0x343   : > { %v2643_v0 = vpop.eup %2642  ;;  %v1409_v43 = vsel %vm1377_vm14, %v2641_v32, 0.0  ;;  %1620 = vmatpush.bf16.msra.mxu0 %v2352_v61  ;;  %2654 = vrcp.f32 %v1368_v21  ;;  %v1418_v6 = vld [vmem:[#allocation4 + $0x30] sm:$0xff]  ;;  %v1420_v9 = vld [vmem:[#allocation4 + $0x58] sm:$0xff]  ;;  %v1430_v47 = vld [vmem:[#allocation4 + $0x60] sm:$0xff] }
 0x344   : > { %v1408_v39 = vsel %vm1376_vm15, %v2643_v0, 0.0  ;;  %v2645_v54 = vpop.eup %2644  ;;  %1717 = vmatpush.bf16.msra.mxu1 %v3935_v50  ;;  %2656 = vrcp.f32 %v1364_v17  ;;  %v1421_v32 = vld [vmem:[#allocation4 + $0x18] sm:$0xff]  ;;  %v1422_v36 = vld [vmem:[#allocation4 + $0x50] sm:$0xff] }
 0x345   : > { %v2647_v29 = vpop.eup %2646  ;;  %v1414_v34 = vsel %vm1382_vm0, %v2645_v54, 0.0  ;;  %2658 = vrcp.f32 %v1365_v10 }
 0x346   : > { %1451 = vperm.xlu1 %2624, %v1405_v53   ;;  %v2649_v38 = vpop.eup %2648  ;;  %v1410_v42 = vsel %vm1378_vm4, %v2647_v29, 0.0  ;;  %2383 = vmatpush.bf16.msra.mxu3 %v2351_v37  ;;  %v1433_v29 = vld [vmem:[#allocation4 + $0x28] sm:$0xff] }
 0x347   : > { %1441 = vperm.xlu0 %2623, %v1403_v31   ;;  %v1415_v7 = vsel %vm1383_vm7, %v2649_v38, 0.0  ;;  %1621 = vmatpush.bf16.msra.mxu0 %v2351_v37  ;;  %v2651_v49 = vpop.eup %2650  ;;  %v1432_v38 = vld [vmem:[#allocation4 + $0x78] sm:$0xff] }
 0x348   : > { %1718 = vmatpush.bf16.msra.mxu1 %v2343_v28  ;;  %v2653_v19 = vpop.eup %2652  ;;  %v1411_v30 = vsel %vm1379_vm1, %v2651_v49, 0.0  ;;  %v1425_v49 = vld [vmem:[#allocation4 + $0x48] sm:$0xff] }
 0x349   : > { %v2655_v18 = vpop.eup %2654  ;;  %v1417_v11 = vsel %vm1385_vm2, %v2653_v19, 0.0 }
 0x34a   : > { %1461 = vperm.xlu2 %2625, %v1407_v45   ;;  %2384 = vmatpush.bf16.msra.mxu3 %v2350_v52  ;;  %v1416_v13 = vsel %vm1384_vm3, %v2655_v18, 0.0  ;;  %v2657_v2 = vpop.eup %2656  ;;  %v1431_v45 = vld [vmem:[#allocation4 + $0x70] sm:$0xff] }
 0x34b   : > { %1622 = vmatpush.bf16.msra.mxu0 %v2350_v52  ;;  %v2659_v16 = vpop.eup %2658  ;;  %v1412_v1 = vsel %vm1380_vm5, %v2657_v2, 0.0  ;;  %v1426_v2 = vld [vmem:[#allocation4 + $0x40] sm:$0xff] }
 0x34c   : > { %1719 = vmatpush.bf16.msra.mxu1 %v2342_v33  ;;  %v1413_v60 = vsel %vm1381_vm9, %v2659_v16, 0.0 }
 0x34e   : > { %1471 = vperm.xlu1 %2624, %v1409_v43   ;;  %2385 = vmatpush.bf16.msra.mxu3 %v2349_v58 }
 0x34f   : > { %1466 = vperm.xlu0 %2623, %v1408_v39   ;;  %1623 = vmatpush.bf16.msra.mxu0 %v2349_v58  ;;  %v2361_v58 = vld [vmem:[#allocation14 + $0x30] sm:$0xff] }
 0x350   : > { %1720 = vmatpush.bf16.msra.mxu1 %v2341_v35 }
 0x352   : > { %1496 = vperm.xlu2 %2625, %v1414_v34   ;;  %2386 = vmatpush.bf16.msra.mxu3 %v2348_v59 }
 0x353   : > { %1624 = vmatpush.bf16.msra.mxu0 %v2348_v59 }
 0x354   : > { %1721 = vmatpush.bf16.msra.mxu1 %v2340_v4 }
 0x356   : > { %1476 = vperm.xlu1 %2624, %v1410_v42   ;;  %2387 = vmatpush.bf16.msra.mxu3 %v2347_v46 }
 0x357   : > { %1501 = vperm.xlu0 %2623, %v1415_v7   ;;  %1625 = vmatpush.bf16.msra.mxu0 %v2347_v46  ;;  %v2359_v46 = vld [vmem:[#allocation14 + $0x20] sm:$0xff] }
 0x358   : > { %1722 = vmatpush.bf16.msra.mxu1 %v2339_v26 }
 0x359   : > { %1656 = vmatmul.bf16.vlgmr.msra.gmra.mxu3 %v4158_v63  ;;  %v1429_v63 = vld [vmem:[#allocation4 + $0x38] sm:$0xff] }
 0x35a   : > { %1481 = vperm.xlu2 %2625, %v1411_v30   ;;  %2388 = vmatpush.bf16.msrb.mxu3 %v3929_v22  ;;  %v2362_v30 = vld [vmem:[#allocation14 + $0x38] sm:$0xff] }
 0x35b   : > { %1626 = vmatmul.bf16.vlgmr.msra.gmra.mxu0 %v4159_v24  ;;  %1876 = vmatpush.bf16.msra.mxu2 %v2362_v30 }
 0x35e   : > { %1511 = vperm.xlu1 %2624, %v1417_v11   ;;  %2389 = vmatpush.bf16.msrb.mxu3 %v3932_v62  ;;  %v2360_v11 = vld [vmem:[#allocation14 + $0x28] sm:$0xff] }
 0x35f   : > { %1506 = vperm.xlu0 %2623, %v1416_v13   ;;  %1877 = vmatpush.bf16.msra.mxu2 %v2361_v58  ;;  %v1427_v13 = vld [vmem:[#allocation4 + $0x20] sm:$0xff] }
 0x362   : > { %1486 = vperm.xlu2 %2625, %v1412_v1   ;;  %2390 = vmatpush.bf16.msrb.mxu3 %v3935_v50  ;;  %v1423_v50 = vld [vmem:[#allocation4 + $0x68] sm:$0xff] }
 0x363   : > { %1878 = vmatpush.bf16.msra.mxu2 %v2360_v11 }
 0x366   : > { %2391 = vmatpush.bf16.msrb.mxu3 %v2343_v28 }
 0x367   : > { %1491 = vperm.xlu0 %2623, %v1413_v60   ;;  %1879 = vmatpush.bf16.msra.mxu2 %v2359_v46 }
 0x369   : > { %1661 = vmatmul.bf16.gmra.mxu3 %v4160_v20  ;;  %v1428_v20 = vld [vmem:[#allocation4 + $0x10] sm:$0xff] }
 0x36a   : > { %2392 = vmatpush.bf16.msrb.mxu3 %v2342_v33  ;;  %v1424_v33 = vld [vmem:[#allocation4 + $0x8] sm:$0xff] }
 0x36b   : > { %1631 = vmatmul.bf16.gmra.mxu0 %v4161_v23 }
 0x36e   : > { %2393 = vmatpush.bf16.msrb.mxu3 %v2341_v35 }
 0x372   : > { %2394 = vmatpush.bf16.msrb.mxu3 %v2340_v4 }
 0x376   : > { %2395 = vmatpush.bf16.msrb.mxu3 %v2339_v26  ;;  %v2357_v26 = vld [vmem:[#allocation14 + $0x10] sm:$0xff] }
 0x37a   : > { %2396 = vmatpush.bf16.msra.mxu3 %v2362_v30 }
 0x37b   : > { %1636 = vmatmul.bf16.gmra.mxu0 %v4162_v51 }
 0x37e   : > { %2397 = vmatpush.bf16.msra.mxu3 %v2361_v58 }
 0x382   : > { %2398 = vmatpush.bf16.msra.mxu3 %v2360_v11 }
 0x386   : > { %2399 = vmatpush.bf16.msra.mxu3 %v2359_v46 }
 0x38b   : > { %1641 = vmatmul.bf16.gmra.mxu0 %v4163_v3  ;;  %v2358_v3 = vld [vmem:[#allocation14 + $0x18] sm:$0xff] }
 0x38c   : > { %1880 = vmatpush.bf16.msra.mxu2 %v2358_v3  ;;  %2400 = vmatpush.bf16.msra.mxu3 %v2358_v3 }
 0x390   : > { %1881 = vmatpush.bf16.msra.mxu2 %v2357_v26  ;;  %2401 = vmatpush.bf16.msra.mxu3 %v2357_v26 }
 0x39b   : > { %1646 = vmatmul.bf16.gmra.mxu0 %v4164_v56  ;;  %v2356_v56 = vld [vmem:[#allocation14 + $0x8] sm:$0xff] }
 0x39c   : > { %v1457_v55 = vpop.permute.xlu2 %1456  ;;  %1882 = vmatpush.bf16.msra.mxu2 %v2356_v56  ;;  %2402 = vmatpush.bf16.msra.mxu3 %v2356_v56 }
 0x39d   : > { %v1518_v37 = vmul.f32 %v1457_v55, %v1422_v36 }
 0x3a4   : > { %v1462_v48 = vpop.permute.xlu2 %1461 }
 0x3a5   : > { %v1519_v42 = vmul.f32 %v1462_v48, %v1423_v50 }
 0x3a7   : > { %v1532_v17 = vpack.c.bf16 %v1519_v42, %v1518_v37 }
 0x3ab   : > { %1651 = vmatmul.bf16.gmra.mxu0 %v4165_v14 }
 0x3ac   : > { %v1497_v0 = vpop.permute.xlu2 %1496 }
 0x3ad   : > { %v1526_v43 = vmul.f32 %v1497_v0, %v1430_v47 }
 0x3b0   : > { %v1447_v44 = vpop.permute.xlu1 %1446 }
 0x3b1   : > { %v1437_v41 = vpop.permute.xlu0 %1436  ;;  %v1516_v12 = vmul.f32 %v1447_v44, %v1420_v9 }
 0x3b2   : > { %v1514_v53 = vmul.f32 %v1437_v41, %v1418_v6  ;;  %v2355_v41 = vld [vmem:[#allocation14] sm:$0xff] }
 0x3b3   : > { %1883 = vmatpush.bf16.msra.mxu2 %v2355_v41  ;;  %2403 = vmatpush.bf16.msra.mxu3 %v2355_v41 }
 0x3b4   : > { %v1482_v59 = vpop.permute.xlu2 %1481 }
 0x3b5   : > { %v1523_v16 = vmul.f32 %v1482_v59, %v1427_v13 }
 0x3b8   : > { %v1452_v5 = vpop.permute.xlu1 %1451 }
 0x3b9   : > { %v1442_v40 = vpop.permute.xlu0 %1441  ;;  %v1517_v22 = vmul.f32 %v1452_v5, %v1421_v32 }
 0x3ba   : > { %v1515_v27 = vmul.f32 %v1442_v40, %v1419_v8 }
 0x3bb   : > { %v1531_v54 = vpack.c.bf16 %v1517_v22, %v1516_v12 }
 0x3bc   : > { %v1530_v31 = vpack.c.bf16 %v1515_v27, %v1514_v53  ;;  %v1487_v23 = vpop.permute.xlu2 %1486  ;;  %v3952_v27 = vld [vmem:[%s4166_s5] ss:$0 sm:$0xff] }
 0x3bd   : > { %v1524_v35 = vmul.f32 %v1487_v23, %v1428_v20 }
 0x3be   : > { %1723 = vmatmul.bf16.vlgmr.msra.gmra.mxu1 %v1530_v31 }
 0x3c0   : > { %v1472_v57 = vpop.permute.xlu1 %1471 }
 0x3c1   : > { %v1467_v25 = vpop.permute.xlu0 %1466  ;;  %v1521_v19 = vmul.f32 %v1472_v57, %v1425_v49 }
 0x3c2   : > { %v1520_v10 = vmul.f32 %v1467_v25, %v1424_v33 }
 0x3c4   : > { %v1533_v18 = vpack.c.bf16 %v1521_v19, %v1520_v10 }
 0x3c8   : > { %v1477_v15 = vpop.permute.xlu1 %1476 }
 0x3c9   : > { %v1502_v62 = vpop.permute.xlu0 %1501  ;;  %v1522_v1 = vmul.f32 %v1477_v15, %v1426_v2 }
 0x3ca   : > { %v1527_v39 = vmul.f32 %v1502_v62, %v1431_v45 }
 0x3cb   : > { %v1534_v60 = vpack.c.bf16 %v1523_v16, %v1522_v1 }
 0x3cc   : > { %v1536_v61 = vpack.c.bf16 %v1527_v39, %v1526_v43 }
 0x3ce   : > { %1728 = vmatmul.bf16.gmra.mxu1 %v1531_v54  ;;  %1753 = vmatmul.bf16.vlgmr.msrb.gmra.mxu3 %v1536_v61 }
 0x3d0   : > { %v1512_v21 = vpop.permute.xlu1 %1511 }
 0x3d1   : > { %v1507_v34 = vpop.permute.xlu0 %1506  ;;  %v1529_v28 = vmul.f32 %v1512_v21, %v1433_v29 }
 0x3d2   : > { %v1528_v7 = vmul.f32 %v1507_v34, %v1432_v38 }
 0x3d4   : > { %v1537_v52 = vpack.c.bf16 %v1529_v28, %v1528_v7 }
 0x3d8   : > { %v1627_v44 = vpop.f32.mrf.mxu0 }
 0x3d9   : > { %v1492_v24 = vpop.permute.xlu0 %1491 }
 0x3da   : > { %v1525_v51 = vmul.f32 %v1492_v24, %v1429_v63 }
 0x3dc   : > { %v1535_v4 = vpack.c.bf16 %v1525_v51, %v1524_v35  ;;  %v1657_v55 = vpop.f32.mrf.mxu3 }
 0x3de   : > { %1733 = vmatmul.bf16.gmra.mxu1 %v1532_v17  ;;  %1758 = vmatmul.bf16.gmra.mxu3 %v1537_v52 }
 0x3e0   : > { %v1629_v6 = vpop.f32.mrf.mxu0 }
 0x3e4   : > { %v1659_v8 = vpop.f32.mrf.mxu3 }
 0x3e8   : > { %v1632_v5 = vpop.f32.mrf.mxu0 }
 0x3ec   : > { %v1662_v40 = vpop.f32.mrf.mxu3 }
 0x3ee   : > { %1738 = vmatmul.bf16.gmra.mxu1 %v1533_v18 }
 0x3f0   : > { %v1634_v48 = vpop.f32.mrf.mxu0 }
 0x3f4   : > { %v1664_v32 = vpop.f32.mrf.mxu3 }
 0x3f8   : > { %v1637_v22 = vpop.f32.mrf.mxu0 }
 0x3fe   : > { %1743 = vmatmul.bf16.gmra.mxu1 %v1534_v60 }
 0x400   : > { %v1639_v50 = vpop.f32.mrf.mxu0 }
 0x408   : > { %v1642_v10 = vpop.f32.mrf.mxu0 }
 0x40e   : > { %1748 = vmatmul.bf16.gmra.mxu1 %v1535_v4 }
 0x410   : > { %v1644_v63 = vpop.f32.mrf.mxu0 }
 0x43b   : > { %v1724_v14 = vpop.f32.mrf.mxu1 }
 0x43c   : > { %v1725_v53 = vadd.f32 %v1724_v14, %v1627_v44  ;;  %v1647_v44 = vpop.f32.mrf.mxu0 }
 0x43e   : > { %v1768_v57 = vadd.f32 %v3952_v27, %v1725_v53 }
 0x440   : > { %v1784_v47 = vmax.f32 %v1768_v57, 0.0 }
 0x443   : > { %v1726_v31 = vpop.f32.mrf.mxu1 }
 0x444   : > { %v1727_v25 = vadd.f32 %v1726_v31, %v1629_v6  ;;  %v1649_v14 = vpop.f32.mrf.mxu0 }
 0x446   : > { %v1769_v9 = vadd.f32 %v3952_v27, %v1727_v25 }
 0x448   : > { %v1785_v0 = vmax.f32 %v1769_v9, 0.0 }
 0x44a   : > { %v1800_v45 = vpack.c.bf16 %v1785_v0, %v1784_v47 }
 0x44b   : > { %v1729_v12 = vpop.f32.mrf.mxu1 }
 0x44c   : > { %1884 = vmatmul.bf16.vlgmr.msra.gmra.mxu2 %v1800_v45  ;;  %v1730_v43 = vadd.f32 %v1729_v12, %v1632_v5 }
 0x44e   : > { %v1770_v15 = vadd.f32 %v3952_v27, %v1730_v43 }
 0x450   : > { %v1786_v29 = vmax.f32 %v1770_v15, 0.0 }
 0x451   : > { %v1754_v62 = vpop.f32.mrf.mxu3 }
 0x452   : > { %v1755_v54 = vadd.f32 %v1754_v62, %v1657_v55 }
 0x453   : > { %v1731_v39 = vpop.f32.mrf.mxu1 }
 0x454   : > { %v1732_v61 = vadd.f32 %v1731_v39, %v1634_v48  ;;  %v1780_v34 = vadd.f32 %v3952_v27, %v1755_v54 }
 0x456   : > { %v1771_v36 = vadd.f32 %v3952_v27, %v1732_v61  ;;  %v1796_v17 = vmax.f32 %v1780_v34, 0.0 }
 0x458   : > { %v1787_v21 = vmax.f32 %v1771_v36, 0.0  ;;  %v2627_v36 = vld [vmem:[%s4167_s21] ss:$0 sm:$0xff] }
 0x459   : > { %v1756_v38 = vpop.f32.mrf.mxu3 }
 0x45a   : > { %v1757_v37 = vadd.f32 %v1756_v38, %v1659_v8  ;;  %v1801_v42 = vpack.c.bf16 %v1787_v21, %v1786_v29 }
 0x45b   : > { %v1734_v28 = vpop.f32.mrf.mxu1 }
 0x45c   : > { %v1781_v7 = vadd.f32 %v3952_v27, %v1757_v37  ;;  %1889 = vmatmul.bf16.gmra.mxu2 %v1801_v42  ;;  %v1735_v33 = vadd.f32 %v1734_v28, %v1637_v22 }
 0x45e   : > { %v1797_v52 = vmax.f32 %v1781_v7, 0.0  ;;  %v1772_v30 = vadd.f32 %v3952_v27, %v1735_v33 }
 0x460   : > { %v1806_v49 = vpack.c.bf16 %v1797_v52, %v1796_v17  ;;  %v1788_v59 = vmax.f32 %v1772_v30, 0.0 }
 0x461   : > { %v1759_v19 = vpop.f32.mrf.mxu3 }
 0x462   : > { %1914 = vmatmul.bf16.vlgmr.msra.gmra.mxu3 %v1806_v49  ;;  %v1760_v11 = vadd.f32 %v1759_v19, %v1662_v40 }
 0x463   : > { %v1736_v18 = vpop.f32.mrf.mxu1 }
 0x464   : > { %v1737_v58 = vadd.f32 %v1736_v18, %v1639_v50  ;;  %v1782_v1 = vadd.f32 %v3952_v27, %v1760_v11 }
 0x466   : > { %v1773_v13 = vadd.f32 %v3952_v27, %v1737_v58  ;;  %v1798_v23 = vmax.f32 %v1782_v1, 0.0 }
 0x468   : > { %v1789_v2 = vmax.f32 %v1773_v13, 0.0 }
 0x469   : > { %v1761_v16 = vpop.f32.mrf.mxu3 }
 0x46a   : > { %v1762_v46 = vadd.f32 %v1761_v16, %v1664_v32  ;;  %v1802_v60 = vpack.c.bf16 %v1789_v2, %v1788_v59  ;;  %v1652_v32 = vpop.f32.mrf.mxu0 }
 0x46b   : > { %v1739_v24 = vpop.f32.mrf.mxu1 }
 0x46c   : > { %v1783_v20 = vadd.f32 %v3952_v27, %v1762_v46  ;;  %1894 = vmatmul.bf16.gmra.mxu2 %v1802_v60  ;;  %v1740_v35 = vadd.f32 %v1739_v24, %v1642_v10 }
 0x46e   : > { %v1799_v51 = vmax.f32 %v1783_v20, 0.0  ;;  %v1774_v26 = vadd.f32 %v3952_v27, %v1740_v35 }
 0x470   : > { %v1807_v4 = vpack.c.bf16 %v1799_v51, %v1798_v23  ;;  %v1790_v55 = vmax.f32 %v1774_v26, 0.0 }
 0x472   : > { %1919 = vmatmul.bf16.gmra.mxu3 %v1807_v4  ;;  %v1654_v12 = vpop.f32.mrf.mxu0 }
 0x473   : > { %v1741_v3 = vpop.f32.mrf.mxu1 }
 0x474   : > { %v1742_v56 = vadd.f32 %v1741_v3, %v1644_v63 }
 0x476   : > { %v1775_v41 = vadd.f32 %v3952_v27, %v1742_v56 }
 0x478   : > { %v1791_v6 = vmax.f32 %v1775_v41, 0.0 }
 0x47a   : > { %v1803_v8 = vpack.c.bf16 %v1791_v6, %v1790_v55 }
 0x47b   : > { %v1744_v5 = vpop.f32.mrf.mxu1 }
 0x47c   : > { %1899 = vmatmul.bf16.gmra.mxu2 %v1803_v8  ;;  %v1745_v40 = vadd.f32 %v1744_v5, %v1647_v44 }
 0x47e   : > { %v1776_v31 = vadd.f32 %v3952_v27, %v1745_v40 }
 0x480   : > { %v1792_v25 = vmax.f32 %v1776_v31, 0.0 }
 0x483   : > { %v1746_v53 = vpop.f32.mrf.mxu1 }
 0x484   : > { %v1747_v48 = vadd.f32 %v1746_v53, %v1649_v14 }
 0x486   : > { %v1777_v57 = vadd.f32 %v3952_v27, %v1747_v48 }
 0x488   : > { %v1793_v9 = vmax.f32 %v1777_v57, 0.0 }
 0x48a   : > { %v1804_v47 = vpack.c.bf16 %v1793_v9, %v1792_v25 }
 0x48b   : > { %v1749_v0 = vpop.f32.mrf.mxu1 }
 0x48c   : > { %1904 = vmatmul.bf16.gmra.mxu2 %v1804_v47  ;;  %v1750_v45 = vadd.f32 %v1749_v0, %v1652_v32 }
 0x48e   : > { %v1778_v43 = vadd.f32 %v3952_v27, %v1750_v45 }
 0x490   : > { %v1794_v15 = vmax.f32 %v1778_v43, 0.0 }
 0x493   : > { %v1751_v22 = vpop.f32.mrf.mxu1 }
 0x494   : > { %v1752_v62 = vadd.f32 %v1751_v22, %v1654_v12 }
 0x496   : > { %v1779_v39 = vadd.f32 %v3952_v27, %v1752_v62 }
 0x498   : > { %v1795_v61 = vmax.f32 %v1779_v39, 0.0 }
 0x49a   : > { %v1805_v54 = vpack.c.bf16 %v1795_v61, %v1794_v15 }
 0x49c   : > { %1909 = vmatmul.bf16.gmra.mxu2 %v1805_v54 }
 0x4cf   : > { %v1885_v50 = vpop.f32.mrf.mxu2 }
 0x4d0   : > { %v1886_v29 = vadd.f32 %v2627_v36, %v1885_v50 }
 0x4d2   : > { %1925 = vst [vmem:[%s3273_s25] sm:$0xff] %v1886_v29 }
 0x4d7   : > { %v1887_v21 = vpop.f32.mrf.mxu2 }
 0x4d8   : > { %v1888_v38 = vadd.f32 %v2627_v36, %v1887_v21 }
 0x4da   : > { %1926 = vst [vmem:[%s3273_s25 + $0x8] sm:$0xff] %v1888_v38 }
 0x4df   : > { %v1890_v34 = vpop.f32.mrf.mxu2 }
 0x4e0   : > { %v1891_v27 = vadd.f32 %v2627_v36, %v1890_v34 }
 0x4e2   : > { %1927 = vst [vmem:[%s3273_s25 + $0x10] sm:$0xff] %v1891_v27 }
 0x4e5   : > { %v1915_v37 = vpop.f32.mrf.mxu3 }
 0x4e6   : > { %v1916_v42 = vadd.f32 %v2627_v36, %v1915_v37 }
 0x4e7   : > { %v1892_v28 = vpop.f32.mrf.mxu2 }
 0x4e8   : > { %1937 = vst [vmem:[%s3273_s25 + $0x60] sm:$0xff] %v1916_v42  ;;  %v1893_v7 = vadd.f32 %v2627_v36, %v1892_v28 }
 0x4ea   : > { %1928 = vst [vmem:[%s3273_s25 + $0x18] sm:$0xff] %v1893_v7 }
 0x4ed   : > { %v1917_v17 = vpop.f32.mrf.mxu3 }
 0x4ee   : > { %v1918_v52 = vadd.f32 %v2627_v36, %v1917_v17 }
 0x4ef   : > { %v1895_v49 = vpop.f32.mrf.mxu2 }
 0x4f0   : > { %1938 = vst [vmem:[%s3273_s25 + $0x68] sm:$0xff] %v1918_v52  ;;  %v1896_v33 = vadd.f32 %v2627_v36, %v1895_v49 }
 0x4f2   : > { %1929 = vst [vmem:[%s3273_s25 + $0x20] sm:$0xff] %v1896_v33 }
 0x4f5   : > { %v1920_v19 = vpop.f32.mrf.mxu3 }
 0x4f6   : > { %v1921_v10 = vadd.f32 %v2627_v36, %v1920_v19 }
 0x4f7   : > { %v1897_v18 = vpop.f32.mrf.mxu2 }
 0x4f8   : > { %1939 = vst [vmem:[%s3273_s25 + $0x70] sm:$0xff] %v1921_v10  ;;  %v1898_v30 = vadd.f32 %v2627_v36, %v1897_v18 }
 0x4fa   : > { %1930 = vst [vmem:[%s3273_s25 + $0x28] sm:$0xff] %v1898_v30 }
 0x4fd   : > { %v1922_v58 = vpop.f32.mrf.mxu3 }
 0x4fe   : > { %v1923_v11 = vadd.f32 %v2627_v36, %v1922_v58 }
 0x4ff   : > { %v1900_v13 = vpop.f32.mrf.mxu2 }
 0x500   : > { %1940 = vst [vmem:[%s3273_s25 + $0x78] sm:$0xff] %v1923_v11  ;;  %v1901_v59 = vadd.f32 %v2627_v36, %v1900_v13 }
 0x502   : > { %1931 = vst [vmem:[%s3273_s25 + $0x30] sm:$0xff] %v1901_v59 }
 0x507   : > { %v1902_v2 = vpop.f32.mrf.mxu2 }
 0x508   : > { %v1903_v16 = vadd.f32 %v2627_v36, %v1902_v2 }
 0x50a   : > { %1932 = vst [vmem:[%s3273_s25 + $0x38] sm:$0xff] %v1903_v16 }
 0x50f   : > { %v1905_v1 = vpop.f32.mrf.mxu2 }
 0x510   : > { %v1906_v46 = vadd.f32 %v2627_v36, %v1905_v1 }
 0x512   : > { %1933 = vst [vmem:[%s3273_s25 + $0x40] sm:$0xff] %v1906_v46 }
 0x517   : > { %v1907_v60 = vpop.f32.mrf.mxu2 }
 0x518   : > { %v1908_v63 = vadd.f32 %v2627_v36, %v1907_v60 }
 0x51a   : > { %1934 = vst [vmem:[%s3273_s25 + $0x48] sm:$0xff] %v1908_v63 }
 0x51f   : > { %v1910_v24 = vpop.f32.mrf.mxu2 }
 0x520   : > { %v1911_v20 = vadd.f32 %v2627_v36, %v1910_v24 }
 0x522   : > { %1935 = vst [vmem:[%s3273_s25 + $0x50] sm:$0xff] %v1911_v20 }
 0x527   : > { %v1912_v23 = vpop.f32.mrf.mxu2 }
 0x528   : > { %v1913_v51 = vadd.f32 %v2627_v36, %v1912_v23 }
 0x52a   : > { %1936 = vst [vmem:[%s3273_s25 + $0x58] sm:$0xff] %v1913_v51 }
 0x52b PF: > { %s4169_s4 = sld [smem:[#allocation51_spill]]  ;;  %s1954_s0 = sshll.u32 %s3273_s25, 4  ;;  %s1955_s0 = int_to_ptr.vmem [resolvable:$true] %s1954_s0 }
 0x52c   : > { %s1942_s27 = scalar_lea.sflag [#allocation7], %s3248_s14 }
 0x531   : > { %s1953_s18 = scalar_lea.hbm %s4169_s4, %s2130_s30  ;;  %s2860_s16 = scalar_lea.hbm %s4169_s4, 256 }
 0x532   : > { %s1956_s20 = sshll.u32 %s1953_s18, 4  ;;  %s1957_s20 = int_to_ptr.hbm [resolvable:$true] %s1956_s20 }
 0x533   : > { %s2854_s24 = sshra.s32 %s1957_s20, 4  ;;  %s2855_s24 = int_to_ptr.hbm [resolvable:$true] %s2854_s24 }
 0x534   : > { %s2856_s7 = scalar_lea.hbm %s2855_s24, 128  ;;  %p2861_p9 = scmp.lt.s32.totalorder %s2855_s24, %s4169_s4 }
 0x535   : > { %p2857_p11 = scmp.ne.s32.totalorder %s2855_s24, %s2856_s7  ;;  %p2862_p10 = scmp.lt.s32.totalorder %s2860_s16, %s2856_s7 }
 0x537   : > { %p2858_p13 = pnand %p2857_p11, %p3141_p0  ;;  %p2863_p6 = por %p2862_p10, %p2861_p9 }
 0x539   : > { %p2859_p8 = pneg %p2858_p13 }
 0x53b   : > { %p2864_p12 = pnand %p2863_p6, %p2859_p8 }
 0x53d   : > { %2867 = shalt.err (!%p2864_p12)
}
 0x53e   : > { %s2989_s14 = smov 128   ;;  %s2990_s25 = smov 8  }
 0x53f   : > { %2422 = dma.vmem_to_hbm [thread:$0]  (%p3141_p0), %s1955_s0, 2048, %s1957_s20, %s1942_s27, %s2989_s14, %s2989_s14, %s2990_s25  }
 0x540 PF: > { %s4171_s30 = sld [smem:[#allocation23_spill]]  ;;  %p2455_p2 = scmp.ge.s32.totalorder %s2978_s15, 2 }
 0x542   : > { %p2445_p7 = pnand %p2455_p2, %p3145_p3 }
 0x544   : > { %p2446_p5 = pneg %p2445_p7 }
 0x546   : > { %s1971_s23 = sand.u32 1, %s4171_s30  }
 0x547   : > { %s1972_s26 = scalar_lea.sflag [#allocation7], %s1971_s23 }
 0x548   : > { %2933 = dma.done.wait (%p2446_p5), %s1972_s26, 2048  }
 0x549   : > { %2935 = vsyncadd (%p2446_p5), %s1972_s26, 4294965248  ;;  %s29_s15 = sadd.s32 1, %s2978_s15   ;;  %s4173_s21 = sld [smem:[#allocation30_spill]] }
 0x54a   : > { %p26_p4 = scmp.ge.s32.totalorder %s29_s15, 12   ;;  %s4174_s12 = sld [smem:[#allocation25_spill]] }
 0x54b   : > { %s4175_s19 = sld [smem:[#allocation28_spill]]  ;;  %s4177_s27 = smov %s2942_s28 }
 0x54c   : > { %s4176_s14 = sld [smem:[#allocation29_spill]]  ;;  %s4178_s28 = smov %s2946_s29 }
 0x54d   : > { %s4179_s29 = smov %s3221_s6  ;;  %s4180_s30 = smov %s2954_s9 }
 0x54e   : > { %s4181_s9 = smov %s2958_s10  ;;  %s4183_s11 = smov %s2970_s13 }
 0x54f   : > { %s4182_s10 = smov %s4173_s21  ;;  %28 = sbr.rel (!%p26_p4) target bundleno = 22 (0x16), region = 141 }
 0x551   : > { %s4184_s13 = smov %s4175_s19 }
 0x554   :  { %1978 = vsyncpa [#allocation6], 1 }
 0x555   :  { %1980 = vsyncpa [#allocation6 + $0x1], 1 }
 0x556   :  { %1981 = vsyncpa [#allocation9], 1 }
 0x557   :  { %1983 = vsyncpa [#allocation9 + $0x1], 1 }
 0x558   :  { %1984 = vsyncpa [#allocation12], 1 }
 0x559   :  { %1985 = vsyncpa [#allocation15], 1 }
 0x55a   :  { %1986 = vsyncpa [#allocation7], 1 }
 0x55b   :  { %1988 = vsyncpa [#allocation7 + $0x1], 1 }

</bundles_post_ra>
